<compile_context>
chip_gen: v7x
topology: tpu7x:2x2x1
jax: 0.10.0
libtpu: 0.0.40
codegen_flags: <defaults>
</compile_context>

<pallas_src>
import functools

import jax
import jax.numpy as jnp
from jax.experimental import pallas as pl
from jax.experimental.pallas import tpu as pltpu


# ---------------------------------------------------------------------------
# Kernel: one B-tile per grid step.
# ---------------------------------------------------------------------------
def memn2n_kernel(q_ref, m_ref, ct_ref, hwt_ref, hb_ref, out_ref, *, hops):
    # q_ref  : [Bt, E]      query embedding sum (E zero-padded to 128)
    # m_ref  : [Bt, M, E]   story embedding sums
    # ct_ref : [E, Cp]      candidate embedding sums, pre-transposed, C padded
    # hwt_ref: [E, E]       linear_H weight, pre-transposed (u @ W^T)
    # hb_ref : [1, E]       linear_H bias
    # out_ref: [Bt, Cp]     logits (lane-dense)
    u = q_ref[...]                                   # [Bt, E]
    m_sum = m_ref[...]                               # [Bt, M, E]
    w_t = hwt_ref[...]                               # [E, E]
    bias = jnp.broadcast_to(hb_ref[...], u.shape)    # hoisted out of hop loop

    for _ in range(hops):
        # attention scores: contract E (lane axis)            -> [Bt, M]
        logits = jnp.sum(m_sum * u[:, None, :], axis=2)
        logits = logits - jnp.max(logits, axis=1, keepdims=True)
        e = jnp.exp(logits)
        inv = pl.reciprocal(jnp.sum(e, axis=1, keepdims=True), approx=True)
        attn = e * inv                                         # [Bt, M]
        # weighted memory sum: contract M                      -> [Bt, E]
        o = jnp.sum(attn[:, :, None] * m_sum, axis=1)
        # linear_H(u) on the MXU, plus bias and memory readout
        u = jnp.dot(u, w_t, preferred_element_type=jnp.float32) + bias + o

    # candidate logits on the MXU, lane-dense output store: [Bt, E] @ [E, Cp]
    out_ref[...] = jnp.dot(u, ct_ref[...], preferred_element_type=jnp.float32)


# ---------------------------------------------------------------------------
# Wrapper / host-side glue.
# ---------------------------------------------------------------------------
def _round_up(x, m):
    return (x + m - 1) // m * m


def _bow_embed_sum(tokens, embed):
    """sum_S embed[tokens] as a counts @ embed matmul.

    Never materializes the expanded [..., S, E] gathered tensor in HBM; token
    counts are ~E x smaller than the gathered activations.
    """
    lead = tokens.shape[:-1]
    S = tokens.shape[-1]
    V, E = embed.shape
    flat = tokens.reshape(-1, S)
    N = flat.shape[0]
    counts = jnp.zeros((N, V), embed.dtype)
    counts = counts.at[jnp.arange(N)[:, None], flat].add(1.0)
    return (counts @ embed).reshape(*lead, E)


def memn2n_forward(stories, query, candidates, embed_A, embed_W, H_w, H_b,
                   hops=3, b_tile=None):
    B = query.shape[0]
    M = stories.shape[1]
    C = candidates.shape[0]
    E = embed_A.shape[1]

    # Lane-dense padding (exact: zero columns / zero candidate rows).
    E_pad = _round_up(E, 128)
    C_pad = _round_up(C, 128)
    if b_tile is None:
        b_tile = min(256, _round_up(B, 8))      # 256-row tiles for big B (MXU)
    B_pad = _round_up(B, b_tile)

    ea = jnp.pad(embed_A.astype(jnp.float32), ((0, 0), (0, E_pad - E)))
    ew = jnp.pad(embed_W.astype(jnp.float32), ((0, 0), (0, E_pad - E)))

    # Pre-reduced embedding sums (no [B,M,S,E] round trip through HBM).
    q_sum = _bow_embed_sum(query, ea)                       # [B, E_pad]
    m_sum = _bow_embed_sum(stories, ea)                     # [B, M, E_pad]
    c_sum = _bow_embed_sum(candidates, ew)                  # [C, E_pad]

    # Pad batch rows with zeros (softmax stays finite; rows sliced off below).
    q_sum = jnp.pad(q_sum, ((0, B_pad - B), (0, 0)))
    m_sum = jnp.pad(m_sum, ((0, B_pad - B), (0, 0), (0, 0)))
    # Candidates: pad C and pre-transpose so the kernel does [B,E] @ [E,Cp].
    c_sum_t = jnp.pad(c_sum, ((0, C_pad - C), (0, 0))).T    # [E_pad, C_pad]

    # torch Linear weight is [out, in]; pre-transpose and zero-pad.
    h_wt = jnp.pad(H_w.astype(jnp.float32).T,
                   ((0, E_pad - E), (0, E_pad - E)))        # [E_pad, E_pad]
    h_b = jnp.pad(H_b.astype(jnp.float32), (0, E_pad - E)).reshape(1, E_pad)

    grid = (B_pad // b_tile,)
    kernel = functools.partial(memn2n_kernel, hops=hops)

    out = pl.pallas_call(
        kernel,
        out_shape=jax.ShapeDtypeStruct((B_pad, C_pad), jnp.float32),
        grid_spec=pltpu.PrefetchScalarGridSpec(
            num_scalar_prefetch=0,
            grid=grid,
            in_specs=[
                pl.BlockSpec((b_tile, E_pad), lambda i: (i, 0)),        # q_sum
                pl.BlockSpec((b_tile, M, E_pad), lambda i: (i, 0, 0)),  # m_sum
                pl.BlockSpec((E_pad, C_pad), lambda i: (0, 0)),         # cand^T
                pl.BlockSpec((E_pad, E_pad), lambda i: (0, 0)),         # H_w^T
                pl.BlockSpec((1, E_pad), lambda i: (0, 0)),             # H_b
            ],
            out_specs=pl.BlockSpec((b_tile, C_pad), lambda i: (i, 0)),
        ),
        compiler_params=pltpu.CompilerParams(
            dimension_semantics=("parallel",),
            vmem_limit_bytes=48 * 1024 * 1024,
        ),
    )(q_sum, m_sum, c_sum_t, h_wt, h_b)

    return out[:B, :C]


# ---------------------------------------------------------------------------
# Pure-JAX reference mirroring the PyTorch forward.
# ---------------------------------------------------------------------------
def memn2n_reference(stories, query, candidates, embed_A, embed_W, H_w, H_b,
                     hops=3):
    q_sum = jnp.take(embed_A, query, axis=0).sum(axis=1)
    m_sum = jnp.take(embed_A, stories, axis=0).sum(axis=2)
    c_sum = jnp.take(embed_W, candidates, axis=0).sum(axis=1)
    u = q_sum
    for _ in range(hops):
        logits = jnp.sum(m_sum * u[:, None, :], axis=2)
        attn = jax.nn.softmax(logits, axis=1)
        attn_stories = jnp.sum(attn[:, :, None] * m_sum, axis=1)
        u = u @ H_w.T + H_b + attn_stories
    return u @ c_sum.T


if __name__ == "__main__":
    # Small, module-consistent shapes.
    batch_size = 2
    vocab_size = 20
    candidates_size = 10
    sentence_size = 8
    memory_size = 6
    embedding_size = 32
    hops = 3

    key = jax.random.PRNGKey(0)
    k_ea, k_ew, k_hw, k_hb, k_st, k_q, k_c = jax.random.split(key, 7)

    # normal(0, 0.1) init, embedding row 0 zeroed (matches the module init).
    embed_A = 0.1 * jax.random.normal(k_ea, (vocab_size, embedding_size),
                                      dtype=jnp.float32)
    embed_A = embed_A.at[0].set(0.0)
    embed_W = 0.1 * jax.random.normal(k_ew, (vocab_size, embedding_size),
                                      dtype=jnp.float32)
    embed_W = embed_W.at[0].set(0.0)
    H_w = 0.1 * jax.random.normal(k_hw, (embedding_size, embedding_size),
                                  dtype=jnp.float32)   # torch Linear: [out, in]
    H_b = 0.1 * jax.random.normal(k_hb, (embedding_size,), dtype=jnp.float32)

    stories = jax.random.randint(
        k_st, (batch_size, memory_size, sentence_size), 0, vocab_size,
        dtype=jnp.int32)
    query = jax.random.randint(
        k_q, (batch_size, sentence_size), 0, vocab_size, dtype=jnp.int32)
    candidates_vec = jax.random.randint(
        k_c, (candidates_size, sentence_size), 0, vocab_size, dtype=jnp.int32)

    out = memn2n_forward(stories, query, candidates_vec, embed_A, embed_W,
                         H_w, H_b, hops=hops)
    out = jax.block_until_ready(out)

    ref = memn2n_reference(stories, query, candidates_vec, embed_A, embed_W,
                           H_w, H_b, hops=hops)
    assert out.shape == (batch_size, candidates_size)
    # Tolerance loosened slightly vs 1e-4 because the in-kernel softmax uses
    # the EUP approximate reciprocal (pl.reciprocal(approx=True)).
    assert jnp.allclose(out, ref, atol=2e-3, rtol=2e-3), (
        f"mismatch: max abs err {jnp.max(jnp.abs(out - ref))}")

    print("KERNEL_OK")
</pallas_src>

<mosaic_0001>
module attributes {stable_mosaic.version = 11 : i64} {
  func.func @memn2n_kernel(%arg0: i32, %arg1: memref<8x128xf32, #tpu.memory_space<vmem>>, %arg2: memref<8x6x128xf32, #tpu.memory_space<vmem>>, %arg3: memref<128x128xf32, #tpu.memory_space<vmem>>, %arg4: memref<128x128xf32, #tpu.memory_space<vmem>>, %arg5: memref<1x128xf32, #tpu.memory_space<vmem>>, %arg6: memref<8x128xf32, #tpu.memory_space<vmem>>) attributes {dimension_semantics = [#tpu.dimension_semantics<parallel>], iteration_bounds = array<i64: 1>, scalar_prefetch = 0 : i64, scratch_operands = 0 : i64, tpu.core_type = #tpu.core_type<tc>, window_params = [{transform_indices = @transform_0, window_bounds = array<i64: 8, 128>}, {transform_indices = @transform_1, window_bounds = array<i64: 8, 6, 128>}, {pipeline_mode = #tpu.pipeline_mode<synchronous>, transform_indices = @transform_2, window_bounds = array<i64: 128, 128>}, {pipeline_mode = #tpu.pipeline_mode<synchronous>, transform_indices = @transform_3, window_bounds = array<i64: 128, 128>}, {pipeline_mode = #tpu.pipeline_mode<synchronous>, transform_indices = @transform_4, window_bounds = array<i64: 1, 128>}, {transform_indices = @transform_5, window_bounds = array<i64: 8, 128>}]} {
    %c0 = arith.constant 0 : index
    %c0_0 = arith.constant 0 : index
    %0 = vector.load %arg1[%c0, %c0_0] : memref<8x128xf32, #tpu.memory_space<vmem>>, vector<8x128xf32>
    %c0_1 = arith.constant 0 : index
    %c0_2 = arith.constant 0 : index
    %c0_3 = arith.constant 0 : index
    %1 = vector.load %arg2[%c0_1, %c0_2, %c0_3] : memref<8x6x128xf32, #tpu.memory_space<vmem>>, vector<8x6x128xf32>
    %c0_4 = arith.constant 0 : index
    %c0_5 = arith.constant 0 : index
    %2 = vector.load %arg4[%c0_4, %c0_5] : memref<128x128xf32, #tpu.memory_space<vmem>>, vector<128x128xf32>
    %c0_6 = arith.constant 0 : index
    %c0_7 = arith.constant 0 : index
    %3 = vector.load %arg5[%c0_6, %c0_7] : memref<1x128xf32, #tpu.memory_space<vmem>>, vector<1x128xf32>
    %4 = vector.shape_cast %3 : vector<1x128xf32> to vector<1x128xf32>
    %5 = vector.broadcast %4 : vector<1x128xf32> to vector<8x128xf32>
    %6 = vector.shape_cast %0 : vector<8x128xf32> to vector<8x1x128xf32>
    %7 = vector.broadcast %6 : vector<8x1x128xf32> to vector<8x6x128xf32>
    %8 = arith.mulf %1, %7 : vector<8x6x128xf32>
    %cst = arith.constant dense<0.000000e+00> : vector<8x6xf32>
    %9 = vector.multi_reduction <add>, %8, %cst [2] : vector<8x6x128xf32> to vector<8x6xf32>
    %cst_8 = arith.constant dense<0xFF800000> : vector<8xf32>
    %10 = vector.multi_reduction <maximumf>, %9, %cst_8 [1] : vector<8x6xf32> to vector<8xf32>
    %11 = vector.shape_cast %10 : vector<8xf32> to vector<8x1xf32>
    %12 = vector.broadcast %11 : vector<8x1xf32> to vector<8x6xf32>
    %13 = arith.subf %9, %12 : vector<8x6xf32>
    %14 = math.exp %13 : vector<8x6xf32>
    %cst_9 = arith.constant dense<0.000000e+00> : vector<8xf32>
    %15 = vector.multi_reduction <add>, %14, %cst_9 [1] : vector<8x6xf32> to vector<8xf32>
    %16 = vector.shape_cast %15 : vector<8xf32> to vector<8x1xf32>
    %17 = tpu.reciprocal %16 {approx = true} : vector<8x1xf32> -> vector<8x1xf32>
    %18 = vector.broadcast %17 : vector<8x1xf32> to vector<8x6xf32>
    %19 = arith.mulf %14, %18 : vector<8x6xf32>
    %20 = vector.shape_cast %19 : vector<8x6xf32> to vector<8x6x1xf32>
    %21 = vector.broadcast %20 : vector<8x6x1xf32> to vector<8x6x128xf32>
    %22 = arith.mulf %21, %1 : vector<8x6x128xf32>
    %cst_10 = arith.constant dense<0.000000e+00> : vector<8x128xf32>
    %23 = vector.multi_reduction <add>, %22, %cst_10 [1] : vector<8x6x128xf32> to vector<8x128xf32>
    %cst_11 = arith.constant dense<0.000000e+00> : vector<8x128xf32>
    %24 = tpu.matmul %0, %2, %cst_11 {dimension_numbers = #tpu.dot_dimension_numbers<[1], [0], [0], [1], [0, 0, 1, 1], [], []>} : vector<8x128xf32>, vector<128x128xf32>, vector<8x128xf32> -> vector<8x128xf32>
    %25 = arith.addf %24, %5 : vector<8x128xf32>
    %26 = arith.addf %25, %23 : vector<8x128xf32>
    %27 = vector.shape_cast %26 : vector<8x128xf32> to vector<8x1x128xf32>
    %28 = vector.broadcast %27 : vector<8x1x128xf32> to vector<8x6x128xf32>
    %29 = arith.mulf %1, %28 : vector<8x6x128xf32>
    %cst_12 = arith.constant dense<0.000000e+00> : vector<8x6xf32>
    %30 = vector.multi_reduction <add>, %29, %cst_12 [2] : vector<8x6x128xf32> to vector<8x6xf32>
    %cst_13 = arith.constant dense<0xFF800000> : vector<8xf32>
    %31 = vector.multi_reduction <maximumf>, %30, %cst_13 [1] : vector<8x6xf32> to vector<8xf32>
    %32 = vector.shape_cast %31 : vector<8xf32> to vector<8x1xf32>
    %33 = vector.broadcast %32 : vector<8x1xf32> to vector<8x6xf32>
    %34 = arith.subf %30, %33 : vector<8x6xf32>
    %35 = math.exp %34 : vector<8x6xf32>
    %cst_14 = arith.constant dense<0.000000e+00> : vector<8xf32>
    %36 = vector.multi_reduction <add>, %35, %cst_14 [1] : vector<8x6xf32> to vector<8xf32>
    %37 = vector.shape_cast %36 : vector<8xf32> to vector<8x1xf32>
    %38 = tpu.reciprocal %37 {approx = true} : vector<8x1xf32> -> vector<8x1xf32>
    %39 = vector.broadcast %38 : vector<8x1xf32> to vector<8x6xf32>
    %40 = arith.mulf %35, %39 : vector<8x6xf32>
    %41 = vector.shape_cast %40 : vector<8x6xf32> to vector<8x6x1xf32>
    %42 = vector.broadcast %41 : vector<8x6x1xf32> to vector<8x6x128xf32>
    %43 = arith.mulf %42, %1 : vector<8x6x128xf32>
    %cst_15 = arith.constant dense<0.000000e+00> : vector<8x128xf32>
    %44 = vector.multi_reduction <add>, %43, %cst_15 [1] : vector<8x6x128xf32> to vector<8x128xf32>
    %cst_16 = arith.constant dense<0.000000e+00> : vector<8x128xf32>
    %45 = tpu.matmul %26, %2, %cst_16 {dimension_numbers = #tpu.dot_dimension_numbers<[1], [0], [0], [1], [0, 0, 1, 1], [], []>} : vector<8x128xf32>, vector<128x128xf32>, vector<8x128xf32> -> vector<8x128xf32>
    %46 = arith.addf %45, %5 : vector<8x128xf32>
    %47 = arith.addf %46, %44 : vector<8x128xf32>
    %48 = vector.shape_cast %47 : vector<8x128xf32> to vector<8x1x128xf32>
    %49 = vector.broadcast %48 : vector<8x1x128xf32> to vector<8x6x128xf32>
    %50 = arith.mulf %1, %49 : vector<8x6x128xf32>
    %cst_17 = arith.constant dense<0.000000e+00> : vector<8x6xf32>
    %51 = vector.multi_reduction <add>, %50, %cst_17 [2] : vector<8x6x128xf32> to vector<8x6xf32>
    %cst_18 = arith.constant dense<0xFF800000> : vector<8xf32>
    %52 = vector.multi_reduction <maximumf>, %51, %cst_18 [1] : vector<8x6xf32> to vector<8xf32>
    %53 = vector.shape_cast %52 : vector<8xf32> to vector<8x1xf32>
    %54 = vector.broadcast %53 : vector<8x1xf32> to vector<8x6xf32>
    %55 = arith.subf %51, %54 : vector<8x6xf32>
    %56 = math.exp %55 : vector<8x6xf32>
    %cst_19 = arith.constant dense<0.000000e+00> : vector<8xf32>
    %57 = vector.multi_reduction <add>, %56, %cst_19 [1] : vector<8x6xf32> to vector<8xf32>
    %58 = vector.shape_cast %57 : vector<8xf32> to vector<8x1xf32>
    %59 = tpu.reciprocal %58 {approx = true} : vector<8x1xf32> -> vector<8x1xf32>
    %60 = vector.broadcast %59 : vector<8x1xf32> to vector<8x6xf32>
    %61 = arith.mulf %56, %60 : vector<8x6xf32>
    %62 = vector.shape_cast %61 : vector<8x6xf32> to vector<8x6x1xf32>
    %63 = vector.broadcast %62 : vector<8x6x1xf32> to vector<8x6x128xf32>
    %64 = arith.mulf %63, %1 : vector<8x6x128xf32>
    %cst_20 = arith.constant dense<0.000000e+00> : vector<8x128xf32>
    %65 = vector.multi_reduction <add>, %64, %cst_20 [1] : vector<8x6x128xf32> to vector<8x128xf32>
    %cst_21 = arith.constant dense<0.000000e+00> : vector<8x128xf32>
    %66 = tpu.matmul %47, %2, %cst_21 {dimension_numbers = #tpu.dot_dimension_numbers<[1], [0], [0], [1], [0, 0, 1, 1], [], []>} : vector<8x128xf32>, vector<128x128xf32>, vector<8x128xf32> -> vector<8x128xf32>
    %67 = arith.addf %66, %5 : vector<8x128xf32>
    %68 = arith.addf %67, %65 : vector<8x128xf32>
    %c0_22 = arith.constant 0 : index
    %c0_23 = arith.constant 0 : index
    %69 = vector.load %arg3[%c0_22, %c0_23] : memref<128x128xf32, #tpu.memory_space<vmem>>, vector<128x128xf32>
    %cst_24 = arith.constant dense<0.000000e+00> : vector<8x128xf32>
    %70 = tpu.matmul %68, %69, %cst_24 {dimension_numbers = #tpu.dot_dimension_numbers<[1], [0], [0], [1], [0, 0, 1, 1], [], []>} : vector<8x128xf32>, vector<128x128xf32>, vector<8x128xf32> -> vector<8x128xf32>
    %c0_25 = arith.constant 0 : index
    %c0_26 = arith.constant 0 : index
    %71 = vector.load %arg6[%c0_25, %c0_26] : memref<8x128xf32, #tpu.memory_space<vmem>>, vector<8x128xf32>
    tpu.vector_store %arg6[%c0_25, %c0_26], %70 {strides = array<i32>} : memref<8x128xf32, #tpu.memory_space<vmem>>, vector<8x128xf32>,
    return
  }
  func.func @transform_0(%arg0: i32) -> (i32, i32) {
    %c0_i32 = arith.constant 0 : i32
    %c0_i32_0 = arith.constant 0 : i32
    return %arg0, %c0_i32 : i32, i32
  }
  func.func @transform_1(%arg0: i32) -> (i32, i32, i32) {
    %c0_i32 = arith.constant 0 : i32
    %c0_i32_0 = arith.constant 0 : i32
    %c0_i32_1 = arith.constant 0 : i32
    return %arg0, %c0_i32, %c0_i32_0 : i32, i32, i32
  }
  func.func @transform_2(%arg0: i32) -> (i32, i32) {
    %c0_i32 = arith.constant 0 : i32
    %c0_i32_0 = arith.constant 0 : i32
    %c0_i32_1 = arith.constant 0 : i32
    return %c0_i32, %c0_i32_0 : i32, i32
  }
  func.func @transform_3(%arg0: i32) -> (i32, i32) {
    %c0_i32 = arith.constant 0 : i32
    %c0_i32_0 = arith.constant 0 : i32
    %c0_i32_1 = arith.constant 0 : i32
    return %c0_i32, %c0_i32_0 : i32, i32
  }
  func.func @transform_4(%arg0: i32) -> (i32, i32) {
    %c0_i32 = arith.constant 0 : i32
    %c0_i32_0 = arith.constant 0 : i32
    %c0_i32_1 = arith.constant 0 : i32
    return %c0_i32, %c0_i32_0 : i32, i32
  }
  func.func @transform_5(%arg0: i32) -> (i32, i32) {
    %c0_i32 = arith.constant 0 : i32
    %c0_i32_0 = arith.constant 0 : i32
    return %arg0, %c0_i32 : i32, i32
  }
}

</mosaic_0001>

<bundles_post_ra>
// kernel: tpu_custom_call.1
= control target key start
LH: loop header
LB: loop body
LE: loop exit
PB: predicated region body
PF: predicated region fallthrough
CT: control target
= control target key end

     0   :  { %10 = vsyncpa [#allocation3], 0  ;;  %s2901_s0 = inlined_call_operand.vmem [shape: f32[8,128], index: 0, kind: input, shape index: {}]   ;;  %s2902_s1 = inlined_call_operand.vmem [shape: f32[8,6,128], index: 1, kind: input, shape index: {}]   ;;  %s2903_s2 = inlined_call_operand.hbm [shape: f32[128,128], index: 2, kind: input, shape index: {}]   ;;  %s2904_s3 = inlined_call_operand.hbm [shape: f32[128,128], index: 3, kind: input, shape index: {}]   ;;  %s2905_s4 = inlined_call_operand.vmem [shape: f32[1,128], index: 4, kind: input, shape index: {}]   ;;  %s2906_s5 = inlined_call_operand.hbm [shape: f32[8,128], index: 5, kind: output, shape index: {}]  }
   0x1   :  { %11 = vsyncpa [#allocation6], 0 }
   0x2   :  { %12 = vsyncpa [#allocation4], 0  ;;  %s2310_s18 = smov [#allocation2]   ;;  %s2238_s22 = scalar_lea.hbm %s2903_s2, 2048 }
   0x3   :  { %s22_s19 = sshll.u32 %s2310_s18, 4  ;;  %p2239_p0 = scmp.ne.s32.totalorder %s2903_s2, %s2238_s22  ;;  %s23_s19 = int_to_ptr.vmem [resolvable:$true] %s22_s19 }
   0x4   :  { %p2242_p1 = scmp.lt.u32.totalorder %s2238_s22, %s2903_s2 }
   0x6   :  { %p2244_p2 = pnand %p2242_p1, %p2239_p0 }
   0x8   :  { %2247 = shalt.err (!%p2244_p2)
}
   0x9   :  { %s2248_s27 = scalar_lea.vmem %s23_s19, 2048  ;;  %p2253_p4 = scmp.lt.s32.totalorder %s23_s19, %s23_s19 }
   0xa   :  { %p2249_p3 = scmp.ne.s32.totalorder %s23_s19, %s2248_s27  ;;  %p2254_p5 = scmp.lt.s32.totalorder %s2248_s27, %s2248_s27 }
   0xc   :  { %p2255_p6 = por %p2254_p5, %p2253_p4 }
   0xe   :  { %p2256_p7 = pnand %p2255_p6, %p2249_p3 }
  0x10   :  { %2259 = shalt.err (!%p2256_p7)
}
  0x11   :  { %s2311_s28 = smov 128   ;;  %s2312_s29 = smov 8  }
  0x12   :  { %28 = dma.hbm_to_vmem [thread:$0]  %s2903_s2, 2048, %s23_s19, [#allocation3], %s2311_s28, %s2311_s28, %s2312_s29  }
  0x13   :  { %s2313_s7 = smov [#allocation5]   ;;  %s2260_s11 = scalar_lea.hbm %s2904_s3, 2048 }
  0x14   :  { %s34_s8 = sshll.u32 %s2313_s7, 4  ;;  %p2261_p8 = scmp.ne.s32.totalorder %s2904_s3, %s2260_s11  ;;  %s35_s8 = int_to_ptr.vmem [resolvable:$true] %s34_s8 }
  0x15   :  { %p2264_p9 = scmp.lt.u32.totalorder %s2260_s11, %s2904_s3 }
  0x17   :  { %p2266_p10 = pnand %p2264_p9, %p2261_p8 }
  0x19   :  { %2269 = shalt.err (!%p2266_p10)
}
  0x1a   :  { %s2270_s16 = scalar_lea.vmem %s35_s8, 2048  ;;  %p2275_p12 = scmp.lt.s32.totalorder %s35_s8, %s35_s8 }
  0x1b   :  { %p2271_p11 = scmp.ne.s32.totalorder %s35_s8, %s2270_s16  ;;  %p2276_p13 = scmp.lt.s32.totalorder %s2270_s16, %s2270_s16 }
  0x1d   :  { %p2277_p0 = por %p2276_p13, %p2275_p12 }
  0x1f   :  { %p2278_p1 = pnand %p2277_p0, %p2271_p11 }
  0x21   :  { %2281 = shalt.err (!%p2278_p1)
}
  0x22   :  { %40 = dma.hbm_to_vmem [thread:$0]  %s2904_s3, 2048, %s35_s8, [#allocation6], %s2311_s28, %s2311_s28, %s2312_s29  }
  0x23   :  { %2304 = dma.done.wait [#allocation3], 2048  }
  0x24   :  { %2305 = vsyncadd [#allocation3], 4294965248 }
  0x25   :  { %2306 = dma.done.wait [#allocation6], 2048  }
  0x26   :  { %2307 = vsyncadd [#allocation6], 4294965248  ;;  %v86_v0 = vlaneseq  ;;  %v2314_v1 = vmov 1966171168   ;;  %v2385_v8 = vld [vmem:[%s2901_s0] sm:$0xff]  ;;  %vm179_vm0 = vcmask 1045504  }
  0x27   :  { %v84_v2 = vunpack.c.l.s4 %v2314_v1  ;;  %v82_v11 = vcombine.high %v2385_v8, %v2385_v8  ;;  %v2399_v15 = vld [vmem:[%s2902_s1] sm:$0x3f]  ;;  %v2407_v20 = vld [vmem:[%s2902_s1 + $0x10] sm:$0x3f]  ;;  %v2412_v21 = vld [vmem:[%s2902_s1 + $0x8] sm:$0x3f] }
  0x28   :  { %v2374_v3 = vshrl.u32 %v86_v0, 7  ;;  %v213_v4 = vand.u32 127, %v86_v0  ;;  %v2420_v27 = vld [vmem:[%s2902_s1 + $0x20] sm:$0x3f]  ;;  %v2425_v28 = vld [vmem:[%s2902_s1 + $0x18] sm:$0x3f] }
  0x29   :  { %v85_v5 = vunpack.c.0.s8 %v84_v2  ;;  %v2437_v37 = vld [vmem:[%s2902_s1 + $0x28] sm:$0x3f]  ;;  %v2447_v44 = vld [vmem:[%s2902_s1 + $0x30] sm:$0x3f]  ;;  %v2455_v48 = vld [vmem:[%s2902_s1 + $0x38] sm:$0x3f] }
  0x2a   :  { %v2377_v6 = vsub.s32 %v213_v4, %v2374_v3  ;;  %v2390_v10 = vsub.s32 0, %v2374_v3  ;;  %vm246_vm1 = vcmask 1041409   ;;  %vm248_vm2 = vcmask 1042434   ;;  %s2319_s25 = smov [#allocation7]  }
  0x2b   :  { %v2380_v7 = vsub.s32 %v85_v5, %v2374_v3  ;;  %vm250_vm3 = vcmask 1043459   ;;  %vm252_vm4 = vcmask 1044484   ;;  %vm254_vm5 = vcmask 1045509   ;;  %s1847_s26 = sshll.u32 %s2319_s25, 4  ;;  %s1848_s26 = int_to_ptr.vmem [resolvable:$true] %s1847_s26 }
  0x2c   :  { %vm256_vm6 = vcmask 1046534   ;;  %vm258_vm7 = vcmask 1047559   ;;  %vm261_vm8 = vcmask 48128   ;;  %vm2317_vm9 = vmmov 0   ;;  %s2282_s27 = scalar_lea.vmem %s1848_s26, 128  ;;  %p2287_p3 = scmp.lt.s32.totalorder %s1848_s26, %s1848_s26 }
  0x2d   :  { %v89_v9 = vrot.slane %v2385_v8, %v2380_v7  ;;  %v96_v14 = vrot.slane %v82_v11, %v2380_v7  ;;  %p2283_p2 = scmp.ne.s32.totalorder %s1848_s26, %s2282_s27  ;;  %p2288_p4 = scmp.lt.s32.totalorder %s2282_s27, %s2282_s27 }
  0x2f   :  { %v105_v12 = vrot.slane %v89_v9, %v2380_v7  ;;  %v97_v13 = vcombine.high %v89_v9, %v89_v9  ;;  %v112_v19 = vrot.slane %v96_v14, %v2380_v7  ;;  %v98_v22 = vcombine.high %v96_v14, %v96_v14  ;;  %p2289_p5 = por %p2288_p4, %p2287_p3 }
  0x31   :  { %v134_v16 = vrot.slane %v105_v12, %v2390_v10  ;;  %v127_v17 = vcombine.high %v105_v12, %v105_v12  ;;  %v119_v18 = vrot.slane %v97_v13, %v2380_v7  ;;  %v150_v29 = vrot.slane %v112_v19, %v2390_v10  ;;  %p2290_p6 = pnand %p2289_p5, %p2283_p2 }
  0x32   :  { %v126_v30 = vrot.slane %v98_v22, %v2380_v7  ;;  %v128_v31 = vcombine.high %v112_v19, %v112_v19 }
  0x33   :  { %v171_v23 = vmul.f32 %v134_v16, %v2399_v15  ;;  %v142_v24 = vrot.slane %v127_v17, %v2390_v10  ;;  %v138_v25 = vrot.slane %v119_v18, %v2390_v10  ;;  %v129_v26 = vcombine.high %v119_v18, %v119_v18 }
  0x34   :  { %v175_v36 = vmul.f32 %v150_v29, %v2420_v27  ;;  %v154_v38 = vrot.slane %v126_v30, %v2390_v10  ;;  %v130_v39 = vcombine.high %v126_v30, %v126_v30  ;;  %v158_v43 = vrot.slane %v128_v31, %v2390_v10 }
  0x35   :  { %v180_v32 = vsel %vm179_vm0, %v171_v23, 0.0  ;;  %v173_v33 = vmul.f32 %v142_v24, %v2407_v20  ;;  %v172_v34 = vmul.f32 %v138_v25, %v2412_v21  ;;  %v146_v35 = vrot.slane %v129_v26, %v2390_v10 }
  0x36   :  { %181 = vadd.xlane.f32.xlu0 %v180_v32  ;;  %v176_v46 = vmul.f32 %v154_v38, %v2437_v37  ;;  %v162_v47 = vrot.slane %v130_v39, %v2390_v10  ;;  %v192_v49 = vsel %vm179_vm0, %v175_v36, 0.0  ;;  %v177_v50 = vmul.f32 %v158_v43, %v2447_v44 }
  0x37   :  { %v186_v40 = vsel %vm179_vm0, %v173_v33, 0.0  ;;  %v183_v41 = vsel %vm179_vm0, %v172_v34, 0.0  ;;  %v174_v42 = vmul.f32 %v146_v35, %v2425_v28  ;;  %v2315_v23 = vmov 0  }
  0x38   :  { %187 = vadd.xlane.f32.xlu1 %v186_v40  ;;  %v195_v51 = vsel %vm179_vm0, %v176_v46, 0.0  ;;  %v178_v52 = vmul.f32 %v162_v47, %v2455_v48  ;;  %v198_v53 = vsel %vm179_vm0, %v177_v50, 0.0  ;;  %2173 = vset.pattern.permute.xlu0 %v2315_v23  ;;  %v2480_v24 = vsub.s32 1, %v2374_v3 }
  0x39   :  { %v189_v45 = vsel %vm179_vm0, %v174_v42, 0.0  ;;  %2172 = vset.pattern.permute.xlu1 %v2315_v23  ;;  %v2483_v25 = vsub.s32 2, %v2374_v3  ;;  %v2486_v26 = vsub.s32 3, %v2374_v3  ;;  %v2492_v33 = vsub.s32 4, %v2374_v3  ;;  %v64_v23 = vld [vmem:[#allocation5 + $0x30] sm:$0xff] }
  0x3a   :  { %184 = vadd.xlane.f32.xlu0 %v183_v41  ;;  %v201_v54 = vsel %vm179_vm0, %v178_v52, 0.0  ;;  %v2496_v41 = vsub.s32 5, %v2374_v3  ;;  %v2500_v46 = vsub.s32 6, %v2374_v3 }
  0x3c   :  { %190 = vadd.xlane.f32.xlu1 %v189_v45 }
  0x3e   :  { %193 = vadd.xlane.f32.xlu0 %v192_v49 }
  0x40   :  { %196 = vadd.xlane.f32.xlu1 %v195_v51  ;;  %v2504_v51 = vsub.s32 7, %v2374_v3 }
  0x42   :  { %199 = vadd.xlane.f32.xlu0 %v198_v53 }
  0x44   :  { %202 = vadd.xlane.f32.xlu1 %v201_v54 }
  0xc3   :  { %v182_v55 = vpop.xlane.xlu0 %181 }
  0xc4   :  { %v217_v58 = vrot.slane %v182_v55, %v2377_v6 }
  0xc5   :  { %v188_v56 = vpop.xlane.xlu1 %187 }
  0xc6   :  { %v225_v60 = vrot.slane %v188_v56, %v2377_v6 }
  0xc7   :  { %v185_v57 = vpop.xlane.xlu0 %184 }
  0xc8   :  { %v221_v59 = vrot.slane %v185_v57, %v2377_v6 }
  0xc9   :  { %v191_v61 = vpop.xlane.xlu1 %190 }
  0xca   :  { %v247_v62 = vsel %vm246_vm1, %v221_v59, %v217_v58  ;;  %v229_v63 = vrot.slane %v191_v61, %v2377_v6 }
  0xcb   :  { %v249_v0 = vsel %vm248_vm2, %v225_v60, %v247_v62  ;;  %v194_v1 = vpop.xlane.xlu0 %193 }
  0xcc   :  { %v251_v2 = vsel %vm250_vm3, %v229_v63, %v249_v0  ;;  %v233_v4 = vrot.slane %v194_v1, %v2377_v6 }
  0xcd   :  { %v197_v5 = vpop.xlane.xlu1 %196 }
  0xce   :  { %v253_v9 = vsel %vm252_vm4, %v233_v4, %v251_v2  ;;  %v237_v11 = vrot.slane %v197_v5, %v2377_v6 }
  0xcf   :  { %v200_v12 = vpop.xlane.xlu0 %199 }
  0xd0   :  { %v241_v13 = vrot.slane %v200_v12, %v2377_v6  ;;  %v255_v14 = vsel %vm254_vm5, %v237_v11, %v253_v9  ;;  %v59_v9 = vld [vmem:[#allocation5 + $0x8] sm:$0xff]  ;;  %v60_v11 = vld [vmem:[#allocation5 + $0x10] sm:$0xff] }
  0xd1   :  { %v203_v16 = vpop.xlane.xlu1 %202 }
  0xd2   :  { %v245_v17 = vrot.slane %v203_v16, %v2377_v6  ;;  %v257_v18 = vsel %vm256_vm6, %v241_v13, %v255_v14  ;;  %v61_v14 = vld [vmem:[#allocation5 + $0x18] sm:$0xff] }
  0xd4   :  { %v259_v19 = vsel %vm258_vm7, %v245_v17, %v257_v18  ;;  %v2070_v17 = vpack.c.bf16 %v61_v14, %v60_v11  ;;  %v62_v18 = vld [vmem:[#allocation5 + $0x20] sm:$0xff] }
  0xd5   :  { %v262_v22 = vsel %vm261_vm8, %v259_v19, -inf  ;;  %v63_v19 = vld [vmem:[#allocation5 + $0x28] sm:$0xff] }
  0xd6   :  { %263 = vmax.xlane.f32.xlu0 %v262_v22  ;;  %v2073_v22 = vpack.c.bf16 %v63_v19, %v62_v18 }
 0x163   :  { %v264_v29 = vpop.xlane.xlu0 %263 }
 0x164   :  { %v269_v30 = vrot.slane %v264_v29, %v2390_v10  ;;  %v273_v31 = vrot.slane %v264_v29, %v2480_v24  ;;  %v277_v32 = vrot.slane %v264_v29, %v2483_v25  ;;  %v281_v34 = vrot.slane %v264_v29, %v2486_v26 }
 0x165   :  { %v285_v42 = vrot.slane %v264_v29, %v2492_v33  ;;  %v289_v47 = vrot.slane %v264_v29, %v2496_v41  ;;  %v293_v52 = vrot.slane %v264_v29, %v2500_v46 }
 0x166   :  { %v306_v35 = vsub.f32 %v182_v55, %v269_v30  ;;  %v307_v36 = vsub.f32 %v185_v57, %v273_v31  ;;  %v308_v38 = vsub.f32 %v188_v56, %v277_v32  ;;  %v309_v43 = vsub.f32 %v191_v61, %v281_v34  ;;  %v66_v31 = vld [vmem:[#allocation5 + $0x40] sm:$0xff]  ;;  %v67_v32 = vld [vmem:[#allocation5 + $0x48] sm:$0xff] }
 0x167   :  { %v310_v49 = vsub.f32 %v194_v1, %v285_v42  ;;  %v311_v53 = vsub.f32 %v197_v5, %v289_v47  ;;  %v297_v57 = vrot.slane %v264_v29, %v2504_v51  ;;  %v312_v58 = vsub.f32 %v200_v12, %v293_v52  ;;  %v58_v5 = vld [vmem:[#allocation5] sm:$0xff]  ;;  %v65_v29 = vld [vmem:[#allocation5 + $0x38] sm:$0xff] }
 0x168   :  { %v314_v39 = vmul.f32 1.442695, %v306_v35  ;;  %v316_v40 = vmul.f32 1.442695, %v307_v36  ;;  %v318_v45 = vmul.f32 1.442695, %v308_v38  ;;  %v2067_v13 = vpack.c.bf16 %v59_v9, %v58_v5 }
 0x169   :  { %v320_v50 = vmul.f32 1.442695, %v309_v43  ;;  %v322_v54 = vmul.f32 1.442695, %v310_v49  ;;  %v324_v59 = vmul.f32 1.442695, %v311_v53  ;;  %v313_v60 = vsub.f32 %v203_v16, %v297_v57 }
 0x16a   :  { %2175 = vpow2.f32 %v314_v39  ;;  %v326_v61 = vmul.f32 1.442695, %v312_v58  ;;  %v2316_v12 = vmov 0.0|0.0   ;;  %v2318_v16 = vmov 0.0   ;;  %v68_v35 = vld [vmem:[#allocation5 + $0x50] sm:$0xff]  ;;  %v69_v36 = vld [vmem:[#allocation5 + $0x58] sm:$0xff] }
 0x16b   :  { %2177 = vpow2.f32 %v316_v40  ;;  %v328_v63 = vmul.f32 1.442695, %v313_v60  ;;  %2066 = vmatprep.subr.bf16.mxu0 %v2316_v12  ;;  %1958 = vmatprep.mubr.msk.f32.mxu0 %vm2317_vm9, %v2318_v16  ;;  %v2076_v30 = vpack.c.bf16 %v65_v29, %v64_v23  ;;  %v2079_v34 = vpack.c.bf16 %v67_v32, %v66_v31  ;;  %v70_v39 = vld [vmem:[#allocation5 + $0x60] sm:$0xff]  ;;  %v71_v40 = vld [vmem:[#allocation5 + $0x68] sm:$0xff]  ;;  %v72_v43 = vld [vmem:[#allocation5 + $0x70] sm:$0xff] }
 0x16c   :  { %2179 = vpow2.f32 %v318_v45  ;;  %2090 = vmatprep.subr.bf16.mxu1 %v2316_v12  ;;  %1993 = vmatprep.mubr.msk.f32.mxu1 %vm2317_vm9, %v2318_v16  ;;  %v2082_v38 = vpack.c.bf16 %v69_v36, %v68_v35  ;;  %v2085_v42 = vpack.c.bf16 %v71_v40, %v70_v39  ;;  %v73_v45 = vld [vmem:[#allocation5 + $0x78] sm:$0xff] }
 0x16d   :  { %2181 = vpow2.f32 %v320_v50  ;;  %2068 = vmatpush3.bf16.msra.mxu0 %v2067_v13  ;;  %2092 = vmatpush3.bf16.msra.mxu1 %v2067_v13  ;;  %v2088_v47 = vpack.c.bf16 %v73_v45, %v72_v43 }
 0x16e   :  { %2183 = vpow2.f32 %v322_v54  ;;  %2069 = vmatprep.subr.bf16.mxu0 %v2316_v12  ;;  %2093 = vmatprep.subr.bf16.mxu1 %v2316_v12 }
 0x16f   :  { %2185 = vpow2.f32 %v324_v59 }
 0x170   :  { %2187 = vpow2.f32 %v326_v61 }
 0x171   :  { %2189 = vpow2.f32 %v328_v63  ;;  %2071 = vmatpush3.bf16.msra.mxu0 %v2070_v17  ;;  %2095 = vmatpush3.bf16.msra.mxu1 %v2070_v17 }
 0x172   :  { %2072 = vmatprep.subr.bf16.mxu0 %v2316_v12  ;;  %2096 = vmatprep.subr.bf16.mxu1 %v2316_v12 }
 0x174   :  { %v2507_v55 = vpop.eup %2175 }
 0x175   :  { %v2509_v56 = vpop.eup %2177  ;;  %339 = vperm.xlu1 %2172, %v2507_v55   ;;  %2074 = vmatpush3.bf16.msra.mxu0 %v2073_v22 }
 0x176   :  { %342 = vperm.xlu0 %2173, %v2509_v56   ;;  %v2514_v3 = vpop.eup %2179  ;;  %2098 = vmatpush3.bf16.msra.mxu1 %v2073_v22 }
 0x177   :  { %v2517_v62 = vpop.eup %2181  ;;  %2075 = vmatprep.subr.bf16.mxu0 %v2316_v12  ;;  %2099 = vmatprep.subr.bf16.mxu1 %v2316_v12 }
 0x178   :  { %v2520_v0 = vpop.eup %2183 }
 0x179   :  { %345 = vperm.xlu1 %2172, %v2514_v3   ;;  %v2523_v1 = vpop.eup %2185  ;;  %2077 = vmatpush3.bf16.msra.mxu0 %v2076_v30 }
 0x17a   :  { %v2526_v2 = vpop.eup %2187  ;;  %2101 = vmatpush3.bf16.msra.mxu1 %v2076_v30  ;;  %2078 = vmatprep.subr.bf16.mxu0 %v2316_v12 }
 0x17b   :  { %v2529_v4 = vpop.eup %2189  ;;  %2102 = vmatprep.subr.bf16.mxu1 %v2316_v12 }
 0x17d   :  { %348 = vperm.xlu1 %2172, %v2517_v62   ;;  %2080 = vmatpush3.bf16.msra.mxu0 %v2079_v34 }
 0x17e   :  { %2104 = vmatpush3.bf16.msra.mxu1 %v2079_v34  ;;  %2081 = vmatprep.subr.bf16.mxu0 %v2316_v12 }
 0x17f   :  { %2105 = vmatprep.subr.bf16.mxu1 %v2316_v12 }
 0x181   :  { %351 = vperm.xlu1 %2172, %v2520_v0   ;;  %2083 = vmatpush3.bf16.msra.mxu0 %v2082_v38 }
 0x182   :  { %2107 = vmatpush3.bf16.msra.mxu1 %v2082_v38  ;;  %2084 = vmatprep.subr.bf16.mxu0 %v2316_v12 }
 0x183   :  { %2108 = vmatprep.subr.bf16.mxu1 %v2316_v12 }
 0x185   :  { %354 = vperm.xlu1 %2172, %v2523_v1   ;;  %2086 = vmatpush3.bf16.msra.mxu0 %v2085_v42 }
 0x186   :  { %2110 = vmatpush3.bf16.msra.mxu1 %v2085_v42  ;;  %2087 = vmatprep.subr.bf16.mxu0 %v2316_v12 }
 0x187   :  { %2111 = vmatprep.subr.bf16.mxu1 %v2316_v12 }
 0x189   :  { %357 = vperm.xlu1 %2172, %v2526_v2   ;;  %2089 = vmatpush3.bf16.msra.mxu0 %v2088_v47 }
 0x18a   :  { %2113 = vmatpush3.bf16.msra.mxu1 %v2088_v47  ;;  %2114 = vmatprep.subr.bf16.mxu0 %v2316_v12 }
 0x18b   :  { %2138 = vmatprep.subr.bf16.mxu1 %v2316_v12 }
 0x18c   :  { %1959 = vmatmul.mubr.f32.vlgmr.msra.gmra.mrb[0].mxu0 %v2385_v8 }
 0x18d   :  { %360 = vperm.xlu1 %2172, %v2529_v4   ;;  %2116 = vmatpush3.bf16.msra.mxu0 %v2067_v13 }
 0x18e   :  { %2028 = vmatprep.mubr.msk.f32.mxu0 %vm2317_vm9, %v2318_v16  ;;  %2117 = vmatprep.subr.bf16.mxu0 %v2316_v12 }
 0x191   :  { %2119 = vmatpush3.bf16.msra.mxu0 %v2070_v17 }
 0x192   :  { %2120 = vmatprep.subr.bf16.mxu0 %v2316_v12 }
 0x195   :  { %2122 = vmatpush3.bf16.msra.mxu0 %v2073_v22 }
 0x196   :  { %2123 = vmatprep.subr.bf16.mxu0 %v2316_v12 }
 0x199   :  { %2125 = vmatpush3.bf16.msra.mxu0 %v2076_v30 }
 0x19a   :  { %2126 = vmatprep.subr.bf16.mxu0 %v2316_v12 }
 0x19d   :  { %2128 = vmatpush3.bf16.msra.mxu0 %v2079_v34 }
 0x19e   :  { %2129 = vmatprep.subr.bf16.mxu0 %v2316_v12 }
 0x1a1   :  { %2131 = vmatpush3.bf16.msra.mxu0 %v2082_v38 }
 0x1a2   :  { %2132 = vmatprep.subr.bf16.mxu0 %v2316_v12 }
 0x1a5   :  { %2134 = vmatpush3.bf16.msra.mxu0 %v2085_v42 }
 0x1a6   :  { %2135 = vmatprep.subr.bf16.mxu0 %v2316_v12 }
 0x1a9   :  { %2137 = vmatpush3.bf16.msra.mxu0 %v2088_v47 }
 0x1f4   :  { %v340_v8 = vpop.permute.xlu1 %339 }
 0x1f5   :  { %v343_v53 = vpop.permute.xlu0 %342  ;;  %v365_v58 = vrot.slane %v340_v8, %v2377_v6 }
 0x1f6   :  { %v369_v57 = vrot.slane %v343_v53, %v2377_v6 }
 0x1f8   :  { %v346_v49 = vpop.permute.xlu1 %345  ;;  %v394_v5 = vsel %vm246_vm1, %v369_v57, %v365_v58 }
 0x1f9   :  { %v373_v59 = vrot.slane %v346_v49, %v2377_v6 }
 0x1fb   :  { %v395_v11 = vsel %vm248_vm2, %v373_v59, %v394_v5 }
 0x1fc   :  { %v349_v50 = vpop.permute.xlu1 %348 }
 0x1fd   :  { %v377_v60 = vrot.slane %v349_v50, %v2377_v6 }
 0x1ff   :  { %v396_v14 = vsel %vm250_vm3, %v377_v60, %v395_v11 }
 0x200   :  { %v352_v52 = vpop.permute.xlu1 %351 }
 0x201   :  { %v381_v61 = vrot.slane %v352_v52, %v2377_v6 }
 0x203   :  { %v397_v17 = vsel %vm252_vm4, %v381_v61, %v396_v14 }
 0x204   :  { %v355_v54 = vpop.permute.xlu1 %354 }
 0x205   :  { %v385_v9 = vrot.slane %v355_v54, %v2377_v6 }
 0x207   :  { %v398_v19 = vsel %vm254_vm5, %v385_v9, %v397_v17 }
 0x208   :  { %v358_v63 = vpop.permute.xlu1 %357 }
 0x209   :  { %v389_v13 = vrot.slane %v358_v63, %v2377_v6 }
 0x20b   :  { %v399_v23 = vsel %vm256_vm6, %v389_v13, %v398_v19 }
 0x20c   :  { %v361_v18 = vpop.permute.xlu1 %360 }
 0x20d   :  { %v393_v22 = vrot.slane %v361_v18, %v2377_v6 }
 0x20f   :  { %v400_v29 = vsel %vm258_vm7, %v393_v22, %v399_v23 }
 0x210   :  { %v402_v30 = vsel %vm261_vm8, %v400_v29, 0.0 }
 0x211   :  { %403 = vadd.xlane.f32.xlu1 %v402_v30 }
 0x25f   :  { %v2596_v50 = vpop.f32.mrb[0].mxu0 }
 0x260   :  { %v1960_v52 = vpop.f32.mrb[1].mxu0 }
 0x29e   :  { %v404_v31 = vpop.xlane.xlu1 %403 }
 0x29f   :  { %2191 = vrcp.f32 %v404_v31 }
 0x2a9   :  { %v2192_v32 = vpop.eup %2191 }
 0x2aa   :  { %v410_v34 = vrot.slane %v2192_v32, %v2390_v10  ;;  %v414_v36 = vrot.slane %v2192_v32, %v2480_v24  ;;  %v418_v39 = vrot.slane %v2192_v32, %v2483_v25  ;;  %v422_v42 = vrot.slane %v2192_v32, %v2486_v26 }
 0x2ab   :  { %v426_v45 = vrot.slane %v2192_v32, %v2492_v33  ;;  %v430_v47 = vrot.slane %v2192_v32, %v2496_v41  ;;  %v434_v8 = vrot.slane %v2192_v32, %v2500_v46  ;;  %v438_v49 = vrot.slane %v2192_v32, %v2504_v51 }
 0x2ac   :  { %v447_v35 = vmul.f32 %v2507_v55, %v410_v34  ;;  %v448_v38 = vmul.f32 %v2509_v56, %v414_v36  ;;  %v449_v40 = vmul.f32 %v2514_v3, %v418_v39  ;;  %v450_v43 = vmul.f32 %v2517_v62, %v422_v42 }
 0x2ad   :  { %v451_v55 = vmul.f32 %v2520_v0, %v426_v45  ;;  %v452_v56 = vmul.f32 %v2523_v1, %v430_v47  ;;  %v453_v3 = vmul.f32 %v2526_v2, %v434_v8  ;;  %v454_v62 = vmul.f32 %v2529_v4, %v438_v49 }
 0x2ae   :  { %457 = vperm.xlu0 %2173, %v447_v35  }
 0x2b2   :  { %462 = vperm.xlu0 %2173, %v448_v38  }
 0x2b6   :  { %467 = vperm.xlu0 %2173, %v449_v40  }
 0x2ba   :  { %472 = vperm.xlu0 %2173, %v450_v43  }
 0x2be   :  { %477 = vperm.xlu0 %2173, %v451_v55  }
 0x2c2   :  { %482 = vperm.xlu0 %2173, %v452_v56  }
 0x2c6   :  { %487 = vperm.xlu0 %2173, %v453_v3  }
 0x2ca   :  { %492 = vperm.xlu0 %2173, %v454_v62  }
 0x32d   :  { %v458_v0 = vpop.permute.xlu0 %457 }
 0x32e   :  { %v495_v1 = vmul.f32 %v458_v0, %v2399_v15 }
 0x330   :  { %v503_v4 = vsel %vm179_vm0, %v495_v1, 0.0 }
 0x331   :  { %v463_v53 = vpop.permute.xlu0 %462  ;;  %v504_v11 = vrot.slane %v503_v4, 4 }
 0x332   :  { %v496_v54 = vmul.f32 %v463_v53, %v2412_v21 }
 0x333   :  { %v505_v23 = vadd.f32 %v504_v11, %v503_v4 }
 0x334   :  { %v510_v2 = vsel %vm179_vm0, %v496_v54, 0.0 }
 0x335   :  { %v468_v57 = vpop.permute.xlu0 %467  ;;  %v511_v63 = vrot.slane %v510_v2, 4  ;;  %v506_v39 = vrot.slane %v505_v23, 2 }
 0x336   :  { %v497_v58 = vmul.f32 %v468_v57, %v2407_v20 }
 0x337   :  { %v512_v18 = vadd.f32 %v511_v63, %v510_v2  ;;  %v507_v49 = vadd.f32 %v506_v39, %v505_v23 }
 0x338   :  { %v517_v59 = vsel %vm179_vm0, %v497_v58, 0.0 }
 0x339   :  { %v473_v60 = vpop.permute.xlu0 %472  ;;  %v518_v5 = vrot.slane %v517_v59, 4  ;;  %v513_v34 = vrot.slane %v512_v18, 2  ;;  %v508_v4 = vrot.slane %v507_v49, 1 }
 0x33a   :  { %v498_v61 = vmul.f32 %v473_v60, %v2425_v28 }
 0x33b   :  { %v519_v19 = vadd.f32 %v518_v5, %v517_v59  ;;  %v514_v47 = vadd.f32 %v513_v34, %v512_v18 }
 0x33c   :  { %v524_v9 = vsel %vm179_vm0, %v498_v61, 0.0 }
 0x33d   :  { %v525_v13 = vrot.slane %v524_v9, 4  ;;  %v478_v14 = vpop.permute.xlu0 %477  ;;  %v520_v36 = vrot.slane %v519_v19, 2  ;;  %v515_v1 = vrot.slane %v514_v47, 1 }
 0x33e   :  { %v499_v17 = vmul.f32 %v478_v14, %v2420_v27 }
 0x33f   :  { %v526_v29 = vadd.f32 %v525_v13, %v524_v9  ;;  %v521_v8 = vadd.f32 %v520_v36, %v519_v19  ;;  %v516_v11 = vadd.f32 %v515_v1, %v514_v47  ;;  %v509_v19 = vadd.f32 %v508_v4, %v507_v49 }
 0x340   :  { %v531_v22 = vsel %vm179_vm0, %v499_v17, 0.0 }
 0x341   :  { %v532_v30 = vrot.slane %v531_v22, 4  ;;  %v483_v31 = vpop.permute.xlu0 %482  ;;  %v527_v40 = vrot.slane %v526_v29, 2  ;;  %v522_v59 = vrot.slane %v521_v8, 1 }
 0x342   :  { %v500_v32 = vmul.f32 %v483_v31, %v2437_v37  ;;  %v637_v31 = vsel %vm246_vm1, %v516_v11, %v509_v19 }
 0x343   :  { %v533_v35 = vadd.f32 %v532_v30, %v531_v22  ;;  %v528_v62 = vadd.f32 %v527_v40, %v526_v29  ;;  %v523_v18 = vadd.f32 %v522_v59, %v521_v8 }
 0x344   :  { %v538_v38 = vsel %vm179_vm0, %v500_v32, 0.0 }
 0x345   :  { %v539_v42 = vrot.slane %v538_v38, 4  ;;  %v488_v43 = vpop.permute.xlu0 %487  ;;  %v534_v45 = vrot.slane %v533_v35, 2  ;;  %v529_v61 = vrot.slane %v528_v62, 1  ;;  %v638_v36 = vsel %vm248_vm2, %v523_v18, %v637_v31 }
 0x346   :  { %v501_v55 = vmul.f32 %v488_v43, %v2447_v44 }
 0x347   :  { %v540_v56 = vadd.f32 %v539_v42, %v538_v38  ;;  %v535_v54 = vadd.f32 %v534_v45, %v533_v35  ;;  %v530_v22 = vadd.f32 %v529_v61, %v528_v62  ;;  %v2618_v35 = vld [vmem:[%s2905_s4] ss:$0 sm:$0xff] }
 0x348   :  { %v545_v3 = vsel %vm179_vm0, %v501_v55, 0.0  ;;  %v626_v42 = vadd.f32 %v2618_v35, %v2596_v50 }
 0x349   :  { %v541_v52 = vrot.slane %v540_v56, 2  ;;  %v546_v0 = vrot.slane %v545_v3, 4  ;;  %v493_v53 = vpop.permute.xlu0 %492  ;;  %v536_v9 = vrot.slane %v535_v54, 1  ;;  %v639_v39 = vsel %vm250_vm3, %v530_v22, %v638_v36 }
 0x34a   :  { %v502_v57 = vmul.f32 %v493_v53, %v2455_v48 }
 0x34b   :  { %v542_v58 = vadd.f32 %v541_v52, %v540_v56  ;;  %v547_v2 = vadd.f32 %v546_v0, %v545_v3  ;;  %v537_v30 = vadd.f32 %v536_v9, %v535_v54 }
 0x34c   :  { %v552_v60 = vsel %vm179_vm0, %v502_v57, 0.0 }
 0x34d   :  { %v548_v63 = vrot.slane %v547_v2, 2  ;;  %v553_v5 = vrot.slane %v552_v60, 4  ;;  %v543_v13 = vrot.slane %v542_v58, 1  ;;  %v640_v43 = vsel %vm252_vm4, %v537_v30, %v639_v39 }
 0x34f   :  { %v549_v14 = vadd.f32 %v548_v63, %v547_v2  ;;  %v554_v17 = vadd.f32 %v553_v5, %v552_v60  ;;  %v544_v32 = vadd.f32 %v543_v13, %v542_v58 }
 0x351   :  { %v550_v23 = vrot.slane %v549_v14, 1  ;;  %v555_v29 = vrot.slane %v554_v17, 2  ;;  %v641_v55 = vsel %vm254_vm5, %v544_v32, %v640_v43 }
 0x353   :  { %v556_v34 = vadd.f32 %v555_v29, %v554_v17  ;;  %v551_v38 = vadd.f32 %v550_v23, %v549_v14 }
 0x355   :  { %v557_v40 = vrot.slane %v556_v34, 1  ;;  %v642_v47 = vsel %vm256_vm6, %v551_v38, %v641_v55 }
 0x357   :  { %v558_v45 = vadd.f32 %v557_v40, %v556_v34 }
 0x359   :  { %v643_v56 = vsel %vm258_vm7, %v558_v45, %v642_v47 }
 0x35a   :  { %v645_v8 = vadd.f32 %v643_v56, %v626_v42 }
 0x35c   :  { %v647_v3 = vcombine.high %v645_v8, %v645_v8  ;;  %v654_v49 = vrot.slane %v645_v8, %v2380_v7  ;;  %1994 = vmatmul.mubr.f32.vlgmr.msra.gmra.mrb[0].mxu1 %v645_v8 }
 0x35d   :  { %2063 = vmatprep.mubr.msk.f32.mxu1 %vm2317_vm9, %v2318_v16 }
 0x35e   :  { %v670_v62 = vrot.slane %v654_v49, %v2380_v7  ;;  %v662_v50 = vcombine.high %v654_v49, %v654_v49  ;;  %v661_v52 = vrot.slane %v647_v3, %v2380_v7 }
 0x360   :  { %v699_v0 = vrot.slane %v670_v62, %v2390_v10  ;;  %v684_v53 = vrot.slane %v662_v50, %v2380_v7  ;;  %v692_v54 = vcombine.high %v670_v62, %v670_v62  ;;  %v677_v57 = vrot.slane %v661_v52, %v2380_v7 }
 0x361   :  { %v663_v59 = vcombine.high %v661_v52, %v661_v52 }
 0x362   :  { %v736_v1 = vmul.f32 %v699_v0, %v2399_v15  ;;  %v703_v58 = vrot.slane %v684_v53, %v2390_v10  ;;  %v707_v2 = vrot.slane %v692_v54, %v2390_v10  ;;  %v715_v16 = vrot.slane %v677_v57, %v2390_v10 }
 0x363   :  { %v694_v63 = vcombine.high %v684_v53, %v684_v53  ;;  %v691_v13 = vrot.slane %v663_v59, %v2380_v7  ;;  %v693_v17 = vcombine.high %v677_v57, %v677_v57 }
 0x364   :  { %v744_v60 = vsel %vm179_vm0, %v736_v1, 0.0  ;;  %v737_v4 = vmul.f32 %v703_v58, %v2412_v21  ;;  %v738_v61 = vmul.f32 %v707_v2, %v2407_v20  ;;  %v740_v9 = vmul.f32 %v715_v16, %v2420_v27 }
 0x365   :  { %745 = vadd.xlane.f32.xlu1 %v744_v60  ;;  %v711_v11 = vrot.slane %v694_v63, %v2390_v10  ;;  %v719_v20 = vrot.slane %v691_v13, %v2390_v10  ;;  %v723_v22 = vrot.slane %v693_v17, %v2390_v10  ;;  %v695_v27 = vcombine.high %v691_v13, %v691_v13 }
 0x366   :  { %v747_v5 = vsel %vm179_vm0, %v737_v4, 0.0  ;;  %v750_v15 = vsel %vm179_vm0, %v738_v61, 0.0  ;;  %v756_v14 = vsel %vm179_vm0, %v740_v9, 0.0 }
 0x367   :  { %748 = vadd.xlane.f32.xlu0 %v747_v5  ;;  %v739_v21 = vmul.f32 %v711_v11, %v2425_v28  ;;  %v741_v19 = vmul.f32 %v719_v20, %v2437_v37  ;;  %v742_v29 = vmul.f32 %v723_v22, %v2447_v44  ;;  %v727_v30 = vrot.slane %v695_v27, %v2390_v10 }
 0x369   :  { %751 = vadd.xlane.f32.xlu1 %v750_v15  ;;  %v753_v18 = vsel %vm179_vm0, %v739_v21, 0.0  ;;  %v759_v23 = vsel %vm179_vm0, %v741_v19, 0.0  ;;  %v762_v28 = vsel %vm179_vm0, %v742_v29, 0.0  ;;  %v743_v31 = vmul.f32 %v727_v30, %v2455_v48 }
 0x36b   :  { %v765_v32 = vsel %vm179_vm0, %v743_v31, 0.0 }
 0x36d   :  { %757 = vadd.xlane.f32.xlu1 %v756_v14 }
 0x371   :  { %754 = vadd.xlane.f32.xlu1 %v753_v18 }
 0x375   :  { %760 = vadd.xlane.f32.xlu1 %v759_v23 }
 0x379   :  { %763 = vadd.xlane.f32.xlu1 %v762_v28 }
 0x37d   :  { %766 = vadd.xlane.f32.xlu1 %v765_v32 }
 0x3f2   :  { %v746_v37 = vpop.xlane.xlu1 %745 }
 0x3f3   :  { %v779_v44 = vrot.slane %v746_v37, %v2377_v6 }
 0x3f4   :  { %v749_v38 = vpop.xlane.xlu0 %748 }
 0x3f5   :  { %v783_v40 = vrot.slane %v749_v38, %v2377_v6 }
 0x3f6   :  { %v752_v34 = vpop.xlane.xlu1 %751 }
 0x3f7   :  { %v787_v42 = vrot.slane %v752_v34, %v2377_v6  ;;  %v808_v45 = vsel %vm246_vm1, %v783_v40, %v779_v44 }
 0x3f9   :  { %v809_v55 = vsel %vm248_vm2, %v787_v42, %v808_v45 }
 0x3fa   :  { %v758_v36 = vpop.xlane.xlu1 %757 }
 0x3fb   :  { %v795_v3 = vrot.slane %v758_v36, %v2377_v6 }
 0x3fe   :  { %v755_v39 = vpop.xlane.xlu1 %754 }
 0x3ff   :  { %v791_v48 = vrot.slane %v755_v39, %v2377_v6 }
 0x401   :  { %v810_v56 = vsel %vm250_vm3, %v791_v48, %v809_v55 }
 0x402   :  { %v761_v43 = vpop.xlane.xlu1 %760  ;;  %v811_v50 = vsel %vm252_vm4, %v795_v3, %v810_v56 }
 0x403   :  { %v799_v8 = vrot.slane %v761_v43, %v2377_v6 }
 0x405   :  { %v812_v0 = vsel %vm254_vm5, %v799_v8, %v811_v50 }
 0x406   :  { %v764_v47 = vpop.xlane.xlu1 %763 }
 0x407   :  { %v803_v49 = vrot.slane %v764_v47, %v2377_v6 }
 0x409   :  { %v813_v53 = vsel %vm256_vm6, %v803_v49, %v812_v0 }
 0x40a   :  { %v767_v62 = vpop.xlane.xlu1 %766 }
 0x40b   :  { %v807_v52 = vrot.slane %v767_v62, %v2377_v6 }
 0x40d   :  { %v814_v54 = vsel %vm258_vm7, %v807_v52, %v813_v53 }
 0x40e   :  { %v816_v57 = vsel %vm261_vm8, %v814_v54, -inf }
 0x40f   :  { %817 = vmax.xlane.f32.xlu1 %v816_v57 }
 0x42f   :  { %v2676_v1 = vpop.f32.mrb[0].mxu1 }
 0x430   :  { %v1995_v58 = vpop.f32.mrb[1].mxu1 }
 0x49c   :  { %v818_v2 = vpop.xlane.xlu1 %817 }
 0x49d   :  { %v823_v16 = vrot.slane %v818_v2, %v2390_v10  ;;  %v827_v59 = vrot.slane %v818_v2, %v2480_v24  ;;  %v831_v60 = vrot.slane %v818_v2, %v2483_v25  ;;  %v839_v4 = vrot.slane %v818_v2, %v2492_v33 }
 0x49e   :  { %v835_v61 = vrot.slane %v818_v2, %v2486_v26  ;;  %v847_v9 = vrot.slane %v818_v2, %v2500_v46  ;;  %v843_v21 = vrot.slane %v818_v2, %v2496_v41  ;;  %v851_v22 = vrot.slane %v818_v2, %v2504_v51 }
 0x49f   :  { %v860_v63 = vsub.f32 %v746_v37, %v823_v16  ;;  %v861_v5 = vsub.f32 %v749_v38, %v827_v59  ;;  %v862_v15 = vsub.f32 %v752_v34, %v831_v60  ;;  %v864_v11 = vsub.f32 %v758_v36, %v839_v4 }
 0x4a0   :  { %v863_v20 = vsub.f32 %v755_v39, %v835_v61  ;;  %v866_v18 = vsub.f32 %v764_v47, %v847_v9  ;;  %v865_v27 = vsub.f32 %v761_v43, %v843_v21  ;;  %v867_v30 = vsub.f32 %v767_v62, %v851_v22 }
 0x4a1   :  { %v868_v13 = vmul.f32 1.442695, %v860_v63  ;;  %v870_v14 = vmul.f32 1.442695, %v861_v5  ;;  %v872_v17 = vmul.f32 1.442695, %v862_v15 }
 0x4a2   :  { %v876_v19 = vmul.f32 1.442695, %v864_v11  ;;  %v874_v23 = vmul.f32 1.442695, %v863_v20  ;;  %v880_v29 = vmul.f32 1.442695, %v866_v18 }
 0x4a3   :  { %2193 = vpow2.f32 %v868_v13  ;;  %v878_v28 = vmul.f32 1.442695, %v865_v27  ;;  %v882_v37 = vmul.f32 1.442695, %v867_v30 }
 0x4a4   :  { %2195 = vpow2.f32 %v870_v14 }
 0x4a5   :  { %2197 = vpow2.f32 %v872_v17 }
 0x4a6   :  { %2199 = vpow2.f32 %v876_v19 }
 0x4a7   :  { %2201 = vpow2.f32 %v874_v23 }
 0x4a8   :  { %2203 = vpow2.f32 %v880_v29 }
 0x4a9   :  { %2205 = vpow2.f32 %v878_v28 }
 0x4aa   :  { %2207 = vpow2.f32 %v882_v37  ;;  %v2713_v37 = vld [vmem:[%s2902_s1 + $0x8] sm:$0x3f] }
 0x4ad   :  { %v2194_v31 = vpop.eup %2193 }
 0x4ae   :  { %v2196_v32 = vpop.eup %2195  ;;  %893 = vperm.xlu1 %2172, %v2194_v31  }
 0x4af   :  { %896 = vperm.xlu0 %2173, %v2196_v32   ;;  %v2198_v34 = vpop.eup %2197 }
 0x4b0   :  { %v2200_v36 = vpop.eup %2199 }
 0x4b1   :  { %v2202_v38 = vpop.eup %2201 }
 0x4b2   :  { %899 = vperm.xlu1 %2172, %v2198_v34   ;;  %v2204_v39 = vpop.eup %2203 }
 0x4b3   :  { %905 = vperm.xlu0 %2173, %v2200_v36   ;;  %v2206_v40 = vpop.eup %2205 }
 0x4b4   :  { %v2208_v44 = vpop.eup %2207 }
 0x4b6   :  { %902 = vperm.xlu1 %2172, %v2202_v38  }
 0x4b7   :  { %911 = vperm.xlu0 %2173, %v2204_v39  }
 0x4ba   :  { %908 = vperm.xlu1 %2172, %v2206_v40  }
 0x4be   :  { %914 = vperm.xlu1 %2172, %v2208_v44  }
 0x52d   :  { %v894_v42 = vpop.permute.xlu1 %893 }
 0x52e   :  { %v897_v43 = vpop.permute.xlu0 %896  ;;  %v919_v55 = vrot.slane %v894_v42, %v2377_v6 }
 0x52f   :  { %v923_v48 = vrot.slane %v897_v43, %v2377_v6 }
 0x531   :  { %v900_v45 = vpop.permute.xlu1 %899  ;;  %v948_v3 = vsel %vm246_vm1, %v923_v48, %v919_v55  ;;  %v2734_v55 = vld [vmem:[%s2902_s1 + $0x18] sm:$0x3f] }
 0x532   :  { %v927_v47 = vrot.slane %v900_v45, %v2377_v6  ;;  %v906_v56 = vpop.permute.xlu0 %905 }
 0x533   :  { %v935_v52 = vrot.slane %v906_v56, %v2377_v6 }
 0x534   :  { %v949_v62 = vsel %vm248_vm2, %v927_v47, %v948_v3 }
 0x535   :  { %v903_v8 = vpop.permute.xlu1 %902 }
 0x536   :  { %v931_v49 = vrot.slane %v903_v8, %v2377_v6  ;;  %v912_v53 = vpop.permute.xlu0 %911 }
 0x537   :  { %v943_v2 = vrot.slane %v912_v53, %v2377_v6 }
 0x538   :  { %v950_v50 = vsel %vm250_vm3, %v931_v49, %v949_v62 }
 0x539   :  { %v909_v0 = vpop.permute.xlu1 %908  ;;  %v951_v57 = vsel %vm252_vm4, %v935_v52, %v950_v50  ;;  %v2741_v52 = vld [vmem:[%s2902_s1 + $0x20] sm:$0x3f] }
 0x53a   :  { %v939_v54 = vrot.slane %v909_v0, %v2377_v6 }
 0x53c   :  { %v952_v58 = vsel %vm254_vm5, %v939_v54, %v951_v57 }
 0x53d   :  { %v915_v16 = vpop.permute.xlu1 %914  ;;  %v953_v60 = vsel %vm256_vm6, %v943_v2, %v952_v58 }
 0x53e   :  { %v947_v59 = vrot.slane %v915_v16, %v2377_v6 }
 0x540   :  { %v954_v4 = vsel %vm258_vm7, %v947_v59, %v953_v60  ;;  %v2748_v60 = vld [vmem:[%s2902_s1 + $0x28] sm:$0x3f] }
 0x541   :  { %v956_v61 = vsel %vm261_vm8, %v954_v4, 0.0 }
 0x542   :  { %957 = vadd.xlane.f32.xlu0 %v956_v61 }
 0x5cf   :  { %v958_v63 = vpop.xlane.xlu0 %957 }
 0x5d0   :  { %2209 = vrcp.f32 %v958_v63 }
 0x5da   :  { %v2210_v5 = vpop.eup %2209 }
 0x5db   :  { %v964_v15 = vrot.slane %v2210_v5, %v2390_v10  ;;  %v968_v11 = vrot.slane %v2210_v5, %v2480_v24  ;;  %v972_v14 = vrot.slane %v2210_v5, %v2483_v25  ;;  %v976_v20 = vrot.slane %v2210_v5, %v2486_v26 }
 0x5dc   :  { %v980_v18 = vrot.slane %v2210_v5, %v2492_v33  ;;  %v984_v22 = vrot.slane %v2210_v5, %v2496_v41  ;;  %v988_v23 = vrot.slane %v2210_v5, %v2500_v46  ;;  %v992_v30 = vrot.slane %v2210_v5, %v2504_v51 }
 0x5dd   :  { %v1001_v9 = vmul.f32 %v2194_v31, %v964_v15  ;;  %v1002_v13 = vmul.f32 %v2196_v32, %v968_v11  ;;  %v1003_v21 = vmul.f32 %v2198_v34, %v972_v14  ;;  %v1004_v17 = vmul.f32 %v2202_v38, %v976_v20  ;;  %v2719_v38 = vld [vmem:[%s2902_s1] sm:$0x3f]  ;;  %v2755_v20 = vld [vmem:[%s2902_s1 + $0x30] sm:$0x3f] }
 0x5de   :  { %v1005_v19 = vmul.f32 %v2200_v36, %v980_v18  ;;  %v1006_v27 = vmul.f32 %v2206_v40, %v984_v22  ;;  %v1007_v29 = vmul.f32 %v2204_v39, %v988_v23  ;;  %v1008_v28 = vmul.f32 %v2208_v44, %v992_v30  ;;  %v2725_v40 = vld [vmem:[%s2902_s1 + $0x10] sm:$0x3f] }
 0x5df   :  { %1011 = vperm.xlu1 %2172, %v1001_v9  }
 0x5e3   :  { %1016 = vperm.xlu1 %2172, %v1002_v13  }
 0x5e7   :  { %1021 = vperm.xlu1 %2172, %v1003_v21  }
 0x5eb   :  { %1026 = vperm.xlu1 %2172, %v1004_v17  }
 0x5ef   :  { %1031 = vperm.xlu1 %2172, %v1005_v19  }
 0x5f3   :  { %1036 = vperm.xlu1 %2172, %v1006_v27  }
 0x5f7   :  { %1041 = vperm.xlu1 %2172, %v1007_v29  }
 0x5fb   :  { %1046 = vperm.xlu1 %2172, %v1008_v28  }
 0x65e   :  { %v1012_v31 = vpop.permute.xlu1 %1011 }
 0x65f   :  { %v1049_v39 = vmul.f32 %v2719_v38, %v1012_v31 }
 0x661   :  { %v1057_v48 = vsel %vm179_vm0, %v1049_v39, 0.0 }
 0x662   :  { %v1017_v32 = vpop.permute.xlu1 %1016  ;;  %v1058_v49 = vrot.slane %v1057_v48, 4 }
 0x663   :  { %v1050_v34 = vmul.f32 %v2713_v37, %v1017_v32 }
 0x664   :  { %v1059_v58 = vadd.f32 %v1058_v49, %v1057_v48 }
 0x665   :  { %v1064_v42 = vsel %vm179_vm0, %v1050_v34, 0.0  ;;  %v2762_v34 = vld [vmem:[%s2902_s1 + $0x38] sm:$0x3f] }
 0x666   :  { %v1022_v36 = vpop.permute.xlu1 %1021  ;;  %v1065_v56 = vrot.slane %v1064_v42, 4  ;;  %v1060_v9 = vrot.slane %v1059_v58, 2 }
 0x667   :  { %v1051_v44 = vmul.f32 %v2725_v40, %v1022_v36 }
 0x668   :  { %v1066_v53 = vadd.f32 %v1065_v56, %v1064_v42  ;;  %v1061_v23 = vadd.f32 %v1060_v9, %v1059_v58 }
 0x669   :  { %v1071_v43 = vsel %vm179_vm0, %v1051_v44, 0.0 }
 0x66a   :  { %v1027_v45 = vpop.permute.xlu1 %1026  ;;  %v1072_v8 = vrot.slane %v1071_v43, 4  ;;  %v1067_v61 = vrot.slane %v1066_v53, 2  ;;  %v1062_v48 = vrot.slane %v1061_v23, 1 }
 0x66b   :  { %v1052_v47 = vmul.f32 %v2734_v55, %v1027_v45 }
 0x66c   :  { %v1073_v54 = vadd.f32 %v1072_v8, %v1071_v43  ;;  %v1068_v18 = vadd.f32 %v1067_v61, %v1066_v53 }
 0x66d   :  { %v1078_v3 = vsel %vm179_vm0, %v1052_v47, 0.0 }
 0x66e   :  { %v1079_v62 = vrot.slane %v1078_v3, 4  ;;  %v1032_v50 = vpop.permute.xlu1 %1031  ;;  %v1074_v5 = vrot.slane %v1073_v54, 2  ;;  %v1069_v39 = vrot.slane %v1068_v18, 1 }
 0x66f   :  { %v1053_v0 = vmul.f32 %v2741_v52, %v1032_v50 }
 0x670   :  { %v1080_v2 = vadd.f32 %v1079_v62, %v1078_v3  ;;  %v1075_v22 = vadd.f32 %v1074_v5, %v1073_v54  ;;  %v1070_v49 = vadd.f32 %v1069_v39, %v1068_v18  ;;  %v1063_v54 = vadd.f32 %v1062_v48, %v1061_v23 }
 0x671   :  { %v1085_v57 = vsel %vm179_vm0, %v1053_v0, 0.0 }
 0x672   :  { %v1086_v16 = vrot.slane %v1085_v57, 4  ;;  %v1037_v59 = vpop.permute.xlu1 %1036  ;;  %v1081_v11 = vrot.slane %v1080_v2, 2  ;;  %v1076_v43 = vrot.slane %v1075_v22, 1 }
 0x673   :  { %v1054_v4 = vmul.f32 %v2748_v60, %v1037_v59  ;;  %v1191_v59 = vsel %vm246_vm1, %v1070_v49, %v1063_v54 }
 0x674   :  { %v1087_v63 = vadd.f32 %v1086_v16, %v1085_v57  ;;  %v1082_v29 = vadd.f32 %v1081_v11, %v1080_v2  ;;  %v1077_v53 = vadd.f32 %v1076_v43, %v1075_v22 }
 0x675   :  { %v1092_v15 = vsel %vm179_vm0, %v1054_v4, 0.0 }
 0x676   :  { %v1093_v13 = vrot.slane %v1092_v15, 4  ;;  %v1042_v14 = vpop.permute.xlu1 %1041  ;;  %v1088_v21 = vrot.slane %v1087_v63, 2  ;;  %v1083_v47 = vrot.slane %v1082_v29, 1 }
 0x677   :  { %v1055_v17 = vmul.f32 %v2755_v20, %v1042_v14 }
 0x678   :  { %v1094_v19 = vadd.f32 %v1093_v13, %v1092_v15  ;;  %v1089_v32 = vadd.f32 %v1088_v21, %v1087_v63  ;;  %v1084_v57 = vadd.f32 %v1083_v47, %v1082_v29  ;;  %v1192_v63 = vsel %vm248_vm2, %v1077_v53, %v1191_v59 }
 0x679   :  { %v1099_v27 = vsel %vm179_vm0, %v1055_v17, 0.0  ;;  %v1180_v21 = vadd.f32 %v2618_v35, %v2676_v1 }
 0x67a   :  { %v1095_v30 = vrot.slane %v1094_v19, 2  ;;  %v1100_v28 = vrot.slane %v1099_v27, 4  ;;  %v1047_v31 = vpop.permute.xlu1 %1046  ;;  %v1090_v3 = vrot.slane %v1089_v32, 1  ;;  %v1193_v15 = vsel %vm250_vm3, %v1084_v57, %v1192_v63 }
 0x67b   :  { %v1056_v36 = vmul.f32 %v2762_v34, %v1047_v31 }
 0x67c   :  { %v1096_v44 = vadd.f32 %v1095_v30, %v1094_v19  ;;  %v1101_v42 = vadd.f32 %v1100_v28, %v1099_v27  ;;  %v1091_v16 = vadd.f32 %v1090_v3, %v1089_v32 }
 0x67d   :  { %v1106_v45 = vsel %vm179_vm0, %v1056_v36, 0.0 }
 0x67e   :  { %v1102_v56 = vrot.slane %v1101_v42, 2  ;;  %v1107_v8 = vrot.slane %v1106_v45, 4  ;;  %v1097_v62 = vrot.slane %v1096_v44, 1  ;;  %v1194_v11 = vsel %vm252_vm4, %v1091_v16, %v1193_v15 }
 0x680   :  { %v1103_v50 = vadd.f32 %v1102_v56, %v1101_v42  ;;  %v1108_v0 = vadd.f32 %v1107_v8, %v1106_v45  ;;  %v1098_v4 = vadd.f32 %v1097_v62, %v1096_v44 }
 0x682   :  { %v1104_v58 = vrot.slane %v1103_v50, 1  ;;  %v1109_v2 = vrot.slane %v1108_v0, 2  ;;  %v1195_v13 = vsel %vm254_vm5, %v1098_v4, %v1194_v11 }
 0x684   :  { %v1110_v61 = vadd.f32 %v1109_v2, %v1108_v0  ;;  %v1105_v5 = vadd.f32 %v1104_v58, %v1103_v50 }
 0x686   :  { %v1111_v9 = vrot.slane %v1110_v61, 1  ;;  %v1196_v17 = vsel %vm256_vm6, %v1105_v5, %v1195_v13 }
 0x688   :  { %v1112_v14 = vadd.f32 %v1111_v9, %v1110_v61 }
 0x68a   :  { %v1197_v18 = vsel %vm258_vm7, %v1112_v14, %v1196_v17 }
 0x68b   :  { %v1199_v19 = vadd.f32 %v1197_v18, %v1180_v21 }
 0x68d   :  { %2029 = vmatmul.mubr.f32.vlgmr.msra.gmra.mrb[2].mxu0 %v1199_v19  ;;  %v1208_v22 = vrot.slane %v1199_v19, %v2380_v7  ;;  %v1201_v27 = vcombine.high %v1199_v19, %v1199_v19 }
 0x68f   :  { %v1224_v23 = vrot.slane %v1208_v22, %v2380_v7  ;;  %v1216_v29 = vcombine.high %v1208_v22, %v1208_v22  ;;  %v1215_v30 = vrot.slane %v1201_v27, %v2380_v7 }
 0x691   :  { %v1253_v28 = vrot.slane %v1224_v23, %v2390_v10  ;;  %v1238_v31 = vrot.slane %v1216_v29, %v2380_v7  ;;  %v1246_v32 = vcombine.high %v1224_v23, %v1224_v23  ;;  %v1231_v35 = vrot.slane %v1215_v30, %v2380_v7 }
 0x692   :  { %v1217_v42 = vcombine.high %v1215_v30, %v1215_v30 }
 0x693   :  { %v1290_v1 = vmul.f32 %v2719_v38, %v1253_v28  ;;  %v1257_v36 = vrot.slane %v1238_v31, %v2390_v10  ;;  %v1261_v39 = vrot.slane %v1246_v32, %v2390_v10  ;;  %v1269_v44 = vrot.slane %v1231_v35, %v2390_v10 }
 0x694   :  { %v1248_v47 = vcombine.high %v1238_v31, %v1238_v31  ;;  %v1245_v62 = vrot.slane %v1217_v42, %v2380_v7  ;;  %v1247_v54 = vcombine.high %v1231_v35, %v1231_v35 }
 0x695   :  { %v1298_v43 = vsel %vm179_vm0, %v1290_v1, 0.0  ;;  %v1291_v45 = vmul.f32 %v2713_v37, %v1257_v36  ;;  %v1292_v48 = vmul.f32 %v2725_v40, %v1261_v39  ;;  %v1294_v3 = vmul.f32 %v2741_v52, %v1269_v44 }
 0x696   :  { %1299 = vadd.xlane.f32.xlu0 %v1298_v43  ;;  %v1265_v49 = vrot.slane %v1248_v47, %v2390_v10  ;;  %v1273_v53 = vrot.slane %v1245_v62, %v2390_v10  ;;  %v1277_v2 = vrot.slane %v1247_v54, %v2390_v10  ;;  %v1249_v16 = vcombine.high %v1245_v62, %v1245_v62 }
 0x697   :  { %v1301_v56 = vsel %vm179_vm0, %v1291_v45, 0.0  ;;  %v1304_v8 = vsel %vm179_vm0, %v1292_v48, 0.0  ;;  %v1310_v50 = vsel %vm179_vm0, %v1294_v3, 0.0 }
 0x698   :  { %1302 = vadd.xlane.f32.xlu1 %v1301_v56  ;;  %v1293_v0 = vmul.f32 %v2734_v55, %v1265_v49  ;;  %v1295_v58 = vmul.f32 %v2748_v60, %v1273_v53  ;;  %v1296_v7 = vmul.f32 %v2755_v20, %v1277_v2  ;;  %v1281_v4 = vrot.slane %v1249_v16, %v2390_v10 }
 0x69a   :  { %1305 = vadd.xlane.f32.xlu0 %v1304_v8  ;;  %v1307_v57 = vsel %vm179_vm0, %v1293_v0, 0.0  ;;  %v1313_v59 = vsel %vm179_vm0, %v1295_v58, 0.0  ;;  %v1316_v61 = vsel %vm179_vm0, %v1296_v7, 0.0  ;;  %v1297_v63 = vmul.f32 %v2762_v34, %v1281_v4 }
 0x69c   :  { %v1319_v5 = vsel %vm179_vm0, %v1297_v63, 0.0 }
 0x69e   :  { %1311 = vadd.xlane.f32.xlu0 %v1310_v50 }
 0x6a2   :  { %1308 = vadd.xlane.f32.xlu0 %v1307_v57 }
 0x6a6   :  { %1314 = vadd.xlane.f32.xlu0 %v1313_v59 }
 0x6aa   :  { %1317 = vadd.xlane.f32.xlu0 %v1316_v61 }
 0x6ae   :  { %1320 = vadd.xlane.f32.xlu0 %v1319_v5 }
 0x723   :  { %v1300_v15 = vpop.xlane.xlu0 %1299 }
 0x724   :  { %v1333_v17 = vrot.slane %v1300_v15, %v2377_v6 }
 0x725   :  { %v1303_v13 = vpop.xlane.xlu1 %1302 }
 0x726   :  { %v1337_v21 = vrot.slane %v1303_v13, %v2377_v6 }
 0x727   :  { %v1306_v9 = vpop.xlane.xlu0 %1305 }
 0x728   :  { %v1341_v18 = vrot.slane %v1306_v9, %v2377_v6  ;;  %v1362_v22 = vsel %vm246_vm1, %v1337_v21, %v1333_v17 }
 0x72a   :  { %v1363_v23 = vsel %vm248_vm2, %v1341_v18, %v1362_v22 }
 0x72b   :  { %v1312_v11 = vpop.xlane.xlu0 %1311 }
 0x72c   :  { %v1349_v31 = vrot.slane %v1312_v11, %v2377_v6 }
 0x72f   :  { %v1309_v14 = vpop.xlane.xlu0 %1308 }
 0x730   :  { %v1345_v27 = vrot.slane %v1309_v14, %v2377_v6 }
 0x732   :  { %v1364_v30 = vsel %vm250_vm3, %v1345_v27, %v1363_v23 }
 0x733   :  { %v1315_v19 = vpop.xlane.xlu0 %1314  ;;  %v1365_v1 = vsel %vm252_vm4, %v1349_v31, %v1364_v30 }
 0x734   :  { %v1353_v28 = vrot.slane %v1315_v19, %v2377_v6 }
 0x736   :  { %v1366_v39 = vsel %vm254_vm5, %v1353_v28, %v1365_v1 }
 0x737   :  { %v1318_v29 = vpop.xlane.xlu0 %1317 }
 0x738   :  { %v1357_v32 = vrot.slane %v1318_v29, %v2377_v6 }
 0x73a   :  { %v1367_v44 = vsel %vm256_vm6, %v1357_v32, %v1366_v39 }
 0x73b   :  { %v1321_v35 = vpop.xlane.xlu0 %1320 }
 0x73c   :  { %v1361_v36 = vrot.slane %v1321_v35, %v2377_v6 }
 0x73e   :  { %v1368_v42 = vsel %vm258_vm7, %v1361_v36, %v1367_v44 }
 0x73f   :  { %v1370_v43 = vsel %vm261_vm8, %v1368_v42, -inf }
 0x740   :  { %1371 = vmax.xlane.f32.xlu0 %v1370_v43 }
 0x760   :  { %v2821_v45 = vpop.f32.mrb[2].mxu0 }
 0x761   :  { %v2030_v48 = vpop.f32.mrb[3].mxu0 }
 0x7cd   :  { %v1372_v47 = vpop.xlane.xlu0 %1371 }
 0x7ce   :  { %v1377_v56 = vrot.slane %v1372_v47, %v2390_v10  ;;  %v1381_v8 = vrot.slane %v1372_v47, %v2480_v24  ;;  %v1385_v3 = vrot.slane %v1372_v47, %v2483_v25  ;;  %v1389_v49 = vrot.slane %v1372_v47, %v2486_v26 }
 0x7cf   :  { %v1393_v62 = vrot.slane %v1372_v47, %v2492_v33  ;;  %v1397_v54 = vrot.slane %v1372_v47, %v2496_v41  ;;  %v1401_v16 = vrot.slane %v1372_v47, %v2500_v46  ;;  %v1405_v4 = vrot.slane %v1372_v47, %v2504_v51 }
 0x7d0   :  { %v1414_v50 = vsub.f32 %v1300_v15, %v1377_v56  ;;  %v1415_v0 = vsub.f32 %v1303_v13, %v1381_v8  ;;  %v1416_v53 = vsub.f32 %v1306_v9, %v1385_v3  ;;  %v1417_v57 = vsub.f32 %v1309_v14, %v1389_v49 }
 0x7d1   :  { %v1418_v59 = vsub.f32 %v1312_v11, %v1393_v62  ;;  %v1419_v61 = vsub.f32 %v1315_v19, %v1397_v54  ;;  %v1420_v5 = vsub.f32 %v1318_v29, %v1401_v16  ;;  %v1421_v13 = vsub.f32 %v1321_v35, %v1405_v4 }
 0x7d2   :  { %v1422_v58 = vmul.f32 1.442695, %v1414_v50  ;;  %v1424_v2 = vmul.f32 1.442695, %v1415_v0  ;;  %v1426_v7 = vmul.f32 1.442695, %v1416_v53 }
 0x7d3   :  { %v1428_v63 = vmul.f32 1.442695, %v1417_v57  ;;  %v1430_v15 = vmul.f32 1.442695, %v1418_v59  ;;  %v1432_v9 = vmul.f32 1.442695, %v1419_v61 }
 0x7d4   :  { %2211 = vpow2.f32 %v1422_v58  ;;  %v1434_v14 = vmul.f32 1.442695, %v1420_v5  ;;  %v1436_v21 = vmul.f32 1.442695, %v1421_v13 }
 0x7d5   :  { %2213 = vpow2.f32 %v1424_v2 }
 0x7d6   :  { %2215 = vpow2.f32 %v1426_v7 }
 0x7d7   :  { %2217 = vpow2.f32 %v1428_v63 }
 0x7d8   :  { %2219 = vpow2.f32 %v1430_v15 }
 0x7d9   :  { %2221 = vpow2.f32 %v1432_v9 }
 0x7da   :  { %2223 = vpow2.f32 %v1434_v14 }
 0x7db   :  { %2225 = vpow2.f32 %v1436_v21  ;;  %v1754_v21 = vld [vmem:[#allocation2] sm:$0xff] }
 0x7de   :  { %v2212_v17 = vpop.eup %2211 }
 0x7df   :  { %v2214_v18 = vpop.eup %2213  ;;  %1447 = vperm.xlu0 %2173, %v2212_v17  }
 0x7e0   :  { %1450 = vperm.xlu1 %2172, %v2214_v18   ;;  %v2216_v11 = vpop.eup %2215 }
 0x7e1   :  { %v2218_v19 = vpop.eup %2217 }
 0x7e2   :  { %v2220_v22 = vpop.eup %2219 }
 0x7e3   :  { %1453 = vperm.xlu0 %2173, %v2216_v11   ;;  %v2222_v27 = vpop.eup %2221 }
 0x7e4   :  { %1456 = vperm.xlu1 %2172, %v2218_v19   ;;  %v2224_v23 = vpop.eup %2223 }
 0x7e5   :  { %v2226_v29 = vpop.eup %2225 }
 0x7e7   :  { %1459 = vperm.xlu0 %2173, %v2220_v22  }
 0x7e8   :  { %1462 = vperm.xlu1 %2172, %v2222_v27  }
 0x7eb   :  { %1465 = vperm.xlu0 %2173, %v2224_v23  }
 0x7ec   :  { %1468 = vperm.xlu1 %2172, %v2226_v29  }
 0x85e   :  { %v1448_v30 = vpop.permute.xlu0 %1447 }
 0x85f   :  { %v1451_v28 = vpop.permute.xlu1 %1450  ;;  %v1473_v32 = vrot.slane %v1448_v30, %v2377_v6 }
 0x860   :  { %v1477_v31 = vrot.slane %v1451_v28, %v2377_v6  ;;  %v1762_v28 = vld [vmem:[#allocation2 + $0x40] sm:$0xff] }
 0x862   :  { %v1454_v35 = vpop.permute.xlu0 %1453  ;;  %v1502_v39 = vsel %vm246_vm1, %v1477_v31, %v1473_v32  ;;  %v1763_v31 = vld [vmem:[#allocation2 + $0x48] sm:$0xff] }
 0x863   :  { %v1457_v1 = vpop.permute.xlu1 %1456  ;;  %v1481_v36 = vrot.slane %v1454_v35, %v2377_v6  ;;  %v2151_v32 = vpack.c.bf16 %v1763_v31, %v1762_v28  ;;  %v1765_v35 = vld [vmem:[#allocation2 + $0x58] sm:$0xff] }
 0x864   :  { %v1485_v44 = vrot.slane %v1457_v1, %v2377_v6 }
 0x865   :  { %v1503_v42 = vsel %vm248_vm2, %v1481_v36, %v1502_v39  ;;  %v1766_v36 = vld [vmem:[#allocation2 + $0x60] sm:$0xff]  ;;  %v1767_v39 = vld [vmem:[#allocation2 + $0x68] sm:$0xff] }
 0x866   :  { %v1460_v43 = vpop.permute.xlu0 %1459  ;;  %v1504_v8 = vsel %vm250_vm3, %v1485_v44, %v1503_v42  ;;  %v2157_v44 = vpack.c.bf16 %v1767_v39, %v1766_v36  ;;  %v1768_v42 = vld [vmem:[#allocation2 + $0x70] sm:$0xff] }
 0x867   :  { %v1463_v48 = vpop.permute.xlu1 %1462  ;;  %v1489_v47 = vrot.slane %v1460_v43, %v2377_v6  ;;  %v1769_v43 = vld [vmem:[#allocation2 + $0x78] sm:$0xff] }
 0x868   :  { %v1493_v56 = vrot.slane %v1463_v48, %v2377_v6  ;;  %v2160_v48 = vpack.c.bf16 %v1769_v43, %v1768_v42 }
 0x869   :  { %v1505_v3 = vsel %vm252_vm4, %v1489_v47, %v1504_v8 }
 0x86a   :  { %v1466_v49 = vpop.permute.xlu0 %1465  ;;  %v1506_v53 = vsel %vm254_vm5, %v1493_v56, %v1505_v3 }
 0x86b   :  { %v1469_v62 = vpop.permute.xlu1 %1468  ;;  %v1497_v50 = vrot.slane %v1466_v49, %v2377_v6 }
 0x86c   :  { %v1501_v0 = vrot.slane %v1469_v62, %v2377_v6 }
 0x86d   :  { %v1507_v54 = vsel %vm256_vm6, %v1497_v50, %v1506_v53 }
 0x86e   :  { %v1508_v57 = vsel %vm258_vm7, %v1501_v0, %v1507_v54 }
 0x86f   :  { %v1510_v58 = vsel %vm261_vm8, %v1508_v57, 0.0 }
 0x870   :  { %1511 = vadd.xlane.f32.xlu0 %v1510_v58 }
 0x8fd   :  { %v1512_v2 = vpop.xlane.xlu0 %1511 }
 0x8fe   :  { %2227 = vrcp.f32 %v1512_v2 }
 0x908   :  { %v2228_v16 = vpop.eup %2227 }
 0x909   :  { %v1518_v59 = vrot.slane %v2228_v16, %v2390_v10  ;;  %v1522_v4 = vrot.slane %v2228_v16, %v2480_v24  ;;  %v1526_v6 = vrot.slane %v2228_v16, %v2483_v25  ;;  %v1530_v5 = vrot.slane %v2228_v16, %v2486_v26  ;;  %v1756_v26 = vld [vmem:[#allocation2 + $0x10] sm:$0xff] }
 0x90a   :  { %v1534_v13 = vrot.slane %v2228_v16, %v2492_v33  ;;  %v1538_v14 = vrot.slane %v2228_v16, %v2496_v41  ;;  %v1542_v24 = vrot.slane %v2228_v16, %v2500_v46  ;;  %v1757_v33 = vld [vmem:[#allocation2 + $0x18] sm:$0xff]  ;;  %v1758_v41 = vld [vmem:[#allocation2 + $0x20] sm:$0xff]  ;;  %v1759_v46 = vld [vmem:[#allocation2 + $0x28] sm:$0xff] }
 0x90b   :  { %v1555_v7 = vmul.f32 %v2212_v17, %v1518_v59  ;;  %v1556_v61 = vmul.f32 %v2214_v18, %v1522_v4  ;;  %v1557_v63 = vmul.f32 %v2216_v11, %v1526_v6  ;;  %v1558_v15 = vmul.f32 %v2218_v19, %v1530_v5  ;;  %v1755_v17 = vld [vmem:[#allocation2 + $0x8] sm:$0xff] }
 0x90c   :  { %v1559_v9 = vmul.f32 %v2220_v22, %v1534_v13  ;;  %v1560_v10 = vmul.f32 %v2222_v27, %v1538_v14  ;;  %v2139_v25 = vpack.c.bf16 %v1755_v17, %v1754_v21  ;;  %v1561_v18 = vmul.f32 %v2224_v23, %v1542_v24  ;;  %v1760_v23 = vld [vmem:[#allocation2 + $0x30] sm:$0xff] }
 0x90d   :  { %1565 = vperm.xlu1 %2172, %v1555_v7   ;;  %v1546_v11 = vrot.slane %v2228_v16, %v2504_v51  ;;  %v2142_v19 = vpack.c.bf16 %v1757_v33, %v1756_v26  ;;  %v2145_v27 = vpack.c.bf16 %v1759_v46, %v1758_v41  ;;  %v1761_v51 = vld [vmem:[#allocation2 + $0x38] sm:$0xff] }
 0x90e   :  { %2140 = vmatpush3.bf16.msra.mxu1 %v2139_v25  ;;  %v2148_v30 = vpack.c.bf16 %v1761_v51, %v1760_v23 }
 0x90f   :  { %2141 = vmatprep.subr.bf16.mxu1 %v2316_v12  ;;  %v1562_v22 = vmul.f32 %v2226_v29, %v1546_v11  ;;  %v1764_v29 = vld [vmem:[#allocation2 + $0x50] sm:$0xff] }
 0x910   :  { %v2154_v1 = vpack.c.bf16 %v1765_v35, %v1764_v29 }
 0x911   :  { %1570 = vperm.xlu1 %2172, %v1556_v61  }
 0x912   :  { %2143 = vmatpush3.bf16.msra.mxu1 %v2142_v19 }
 0x913   :  { %2144 = vmatprep.subr.bf16.mxu1 %v2316_v12 }
 0x915   :  { %1575 = vperm.xlu1 %2172, %v1557_v63  }
 0x916   :  { %2146 = vmatpush3.bf16.msra.mxu1 %v2145_v27 }
 0x917   :  { %2147 = vmatprep.subr.bf16.mxu1 %v2316_v12 }
 0x919   :  { %1580 = vperm.xlu1 %2172, %v1558_v15  }
 0x91a   :  { %2149 = vmatpush3.bf16.msra.mxu1 %v2148_v30 }
 0x91b   :  { %2150 = vmatprep.subr.bf16.mxu1 %v2316_v12 }
 0x91d   :  { %1585 = vperm.xlu1 %2172, %v1559_v9  }
 0x91e   :  { %2152 = vmatpush3.bf16.msra.mxu1 %v2151_v32 }
 0x91f   :  { %2153 = vmatprep.subr.bf16.mxu1 %v2316_v12 }
 0x921   :  { %1590 = vperm.xlu1 %2172, %v1560_v10  }
 0x922   :  { %2155 = vmatpush3.bf16.msra.mxu1 %v2154_v1 }
 0x923   :  { %2156 = vmatprep.subr.bf16.mxu1 %v2316_v12 }
 0x925   :  { %1595 = vperm.xlu1 %2172, %v1561_v18  }
 0x926   :  { %2158 = vmatpush3.bf16.msra.mxu1 %v2157_v44 }
 0x927   :  { %2159 = vmatprep.subr.bf16.mxu1 %v2316_v12 }
 0x929   :  { %1600 = vperm.xlu1 %2172, %v1562_v22  }
 0x92a   :  { %2161 = vmatpush3.bf16.msra.mxu1 %v2160_v48 }
 0x98c   :  { %v1566_v47 = vpop.permute.xlu1 %1565 }
 0x98d   :  { %v1603_v49 = vmul.f32 %v2719_v38, %v1566_v47 }
 0x98f   :  { %v1611_v54 = vsel %vm179_vm0, %v1603_v49, 0.0 }
 0x990   :  { %v1571_v56 = vpop.permute.xlu1 %1570  ;;  %v1612_v16 = vrot.slane %v1611_v54, 4 }
 0x991   :  { %v1604_v8 = vmul.f32 %v2713_v37, %v1571_v56 }
 0x992   :  { %v1613_v61 = vadd.f32 %v1612_v16, %v1611_v54  ;;  %v2237_v16 = vld [vmem:[%s2905_s4] ss:$0 sm:$0xff] }
 0x993   :  { %v1618_v50 = vsel %vm179_vm0, %v1604_v8, 0.0 }
 0x994   :  { %v1576_v3 = vpop.permute.xlu1 %1575  ;;  %v1619_v12 = vrot.slane %v1618_v50, 4  ;;  %v1614_v10 = vrot.slane %v1613_v61, 2 }
 0x995   :  { %v1605_v62 = vmul.f32 %v2725_v40, %v1576_v3 }
 0x996   :  { %v1620_v7 = vadd.f32 %v1619_v12, %v1618_v50  ;;  %v1615_v19 = vadd.f32 %v1614_v10, %v1613_v61 }
 0x997   :  { %v1625_v0 = vsel %vm179_vm0, %v1605_v62, 0.0 }
 0x998   :  { %v1581_v53 = vpop.permute.xlu1 %1580  ;;  %v1626_v58 = vrot.slane %v1625_v0, 4 }
 0x999   :  { %v1606_v57 = vmul.f32 %v2734_v55, %v1581_v53  ;;  %v1621_v55 = vrot.slane %v1620_v7, 2 }
 0x99a   :  { %v1627_v40 = vadd.f32 %v1626_v58, %v1625_v0 }
 0x99b   :  { %v1632_v2 = vsel %vm179_vm0, %v1606_v57, 0.0  ;;  %v1622_v18 = vadd.f32 %v1621_v55, %v1620_v7 }
 0x99c   :  { %v1633_v37 = vrot.slane %v1632_v2, 4  ;;  %v1586_v59 = vpop.permute.xlu1 %1585  ;;  %v1628_v9 = vrot.slane %v1627_v40, 2 }
 0x99d   :  { %v1607_v38 = vmul.f32 %v2741_v52, %v1586_v59  ;;  %v1623_v51 = vrot.slane %v1622_v18, 1 }
 0x99e   :  { %v1634_v6 = vadd.f32 %v1633_v37, %v1632_v2  ;;  %v1629_v26 = vadd.f32 %v1628_v9, %v1627_v40  ;;  %v1734_v37 = vadd.f32 %v2237_v16, %v2821_v45 }
 0x99f   :  { %v1639_v4 = vsel %vm179_vm0, %v1607_v38, 0.0  ;;  %v1624_v39 = vadd.f32 %v1623_v51, %v1622_v18 }
 0x9a0   :  { %v1640_v63 = vrot.slane %v1639_v4, 4  ;;  %v1591_v5 = vpop.permute.xlu1 %1590  ;;  %v1635_v24 = vrot.slane %v1634_v6, 2  ;;  %v1630_v31 = vrot.slane %v1629_v26, 1 }
 0x9a1   :  { %v1608_v15 = vmul.f32 %v2748_v60, %v1591_v5 }
 0x9a2   :  { %v1641_v13 = vadd.f32 %v1640_v63, %v1639_v4  ;;  %v1636_v22 = vadd.f32 %v1635_v24, %v1634_v6  ;;  %v1631_v48 = vadd.f32 %v1630_v31, %v1629_v26 }
 0x9a3   :  { %v1646_v14 = vsel %vm179_vm0, %v1608_v15, 0.0 }
 0x9a4   :  { %v1647_v21 = vrot.slane %v1646_v14, 4  ;;  %v1596_v17 = vpop.permute.xlu1 %1595  ;;  %v1642_v52 = vrot.slane %v1641_v13, 2  ;;  %v1637_v29 = vrot.slane %v1636_v22, 1 }
 0x9a5   :  { %v1609_v25 = vmul.f32 %v2755_v20, %v1596_v17  ;;  %v1616_v20 = vrot.slane %v1615_v19, 1 }
 0x9a6   :  { %v1648_v11 = vadd.f32 %v1647_v21, %v1646_v14  ;;  %v1643_v27 = vadd.f32 %v1642_v52, %v1641_v13  ;;  %v1638_v56 = vadd.f32 %v1637_v29, %v1636_v22 }
 0x9a7   :  { %v1653_v33 = vsel %vm179_vm0, %v1609_v25, 0.0  ;;  %v1617_v47 = vadd.f32 %v1616_v20, %v1615_v19 }
 0x9a8   :  { %v1649_v60 = vrot.slane %v1648_v11, 2  ;;  %v1654_v41 = vrot.slane %v1653_v33, 4  ;;  %v1601_v46 = vpop.permute.xlu1 %1600  ;;  %v1644_v36 = vrot.slane %v1643_v27, 1 }
 0x9a9   :  { %v1610_v23 = vmul.f32 %v2762_v34, %v1601_v46  ;;  %v1745_v49 = vsel %vm246_vm1, %v1624_v39, %v1617_v47 }
 0x9aa   :  { %v1650_v30 = vadd.f32 %v1649_v60, %v1648_v11  ;;  %v1655_v28 = vadd.f32 %v1654_v41, %v1653_v33  ;;  %v1645_v3 = vadd.f32 %v1644_v36, %v1643_v27  ;;  %v1746_v0 = vsel %vm248_vm2, %v1631_v48, %v1745_v49 }
 0x9ab   :  { %v1660_v32 = vsel %vm179_vm0, %v1610_v23, 0.0  ;;  %v1747_v54 = vsel %vm250_vm3, %v1638_v56, %v1746_v0 }
 0x9ac   :  { %v1656_v35 = vrot.slane %v1655_v28, 2  ;;  %v1661_v1 = vrot.slane %v1660_v32, 4  ;;  %v1651_v44 = vrot.slane %v1650_v30, 1  ;;  %v1748_v12 = vsel %vm252_vm4, %v1645_v3, %v1747_v54 }
 0x9ae   :  { %v1657_v42 = vadd.f32 %v1656_v35, %v1655_v28  ;;  %v1662_v43 = vadd.f32 %v1661_v1, %v1660_v32  ;;  %v1652_v62 = vadd.f32 %v1651_v44, %v1650_v30 }
 0x9b0   :  { %v1658_v8 = vrot.slane %v1657_v42, 1  ;;  %v1663_v34 = vrot.slane %v1662_v43, 2  ;;  %v1749_v58 = vsel %vm254_vm5, %v1652_v62, %v1748_v12 }
 0x9b2   :  { %v1664_v50 = vadd.f32 %v1663_v34, %v1662_v43  ;;  %v1659_v53 = vadd.f32 %v1658_v8, %v1657_v42 }
 0x9b4   :  { %v1665_v57 = vrot.slane %v1664_v50, 1  ;;  %v1750_v59 = vsel %vm256_vm6, %v1659_v53, %v1749_v58 }
 0x9b6   :  { %v1666_v2 = vadd.f32 %v1665_v57, %v1664_v50 }
 0x9b8   :  { %v1751_v38 = vsel %vm258_vm7, %v1666_v2, %v1750_v59 }
 0x9b9   :  { %v1753_v7 = vadd.f32 %v1751_v38, %v1734_v37 }
 0x9bb   :  { %2064 = vmatmul.mubr.f32.vlgmr.msra.gmra.mrb[2].mxu1 %v1753_v7 }
 0xa8e   :  { %v1836_v40 = vpop.f32.mrb[2].mxu1 }
 0xa8f   :  { %1840 = vst [vmem:[#allocation7] sm:$0xff] %v1836_v40  ;;  %v2065_v4 = vpop.f32.mrb[3].mxu1 }
 0xa90   :  { %2293 = shalt.err (!%p2290_p6)
}
 0xa91   :  { %s2294_s29 = scalar_lea.hbm %s2906_s5, 128 }
 0xa92   :  { %p2295_p7 = scmp.ne.s32.totalorder %s2906_s5, %s2294_s29  ;;  %p2298_p8 = scmp.lt.u32.totalorder %s2294_s29, %s2906_s5 }
 0xa94   :  { %p2300_p9 = pnand %p2298_p8, %p2295_p7 }
 0xa96   :  { %2303 = shalt.err (!%p2300_p9)
}
 0xa97   :  { %1850 = dma.vmem_to_hbm [thread:$0]  %s1848_s26, 128, %s2906_s5, [#allocation4]  }
 0xa98   :  { %2308 = dma.done.wait [#allocation4], 128  }
 0xa99   :  { %2309 = vsyncadd [#allocation4], 4294967168 }
 0xa9a   :  { %1854 = vsyncpa [#allocation3], 1 }
 0xa9b   :  { %1855 = vsyncpa [#allocation6], 1 }
 0xa9c   :  { %1856 = vsyncpa [#allocation4], 1 }

</bundles_post_ra>
